<compile_context>
chip_gen: v6e
topology: v6e:2x2x1
jax: 0.10.0
libtpu: 0.0.40
codegen_flags: <defaults>
</compile_context>

<pallas_src>
import functools

import jax
import jax.numpy as jnp
import numpy as np
from jax.experimental import pallas as pl
from jax.experimental.pallas import tpu as pltpu


def _round_up(x: int, m: int) -> int:
    return (x + m - 1) // m * m


# ----------------------------------------------------------------------------
# Pallas kernels
# ----------------------------------------------------------------------------
def _sine_kernel(x_ref, w_ref, b_ref, o_ref, acc_ref, *, omega_0: float):
    """o = sin(omega_0 * (x @ W + b)), K-reduction over grid axis 2."""
    k = pl.program_id(2)

    @pl.when(k == 0)
    def _():
        acc_ref[...] = jnp.zeros_like(acc_ref)

    acc_ref[...] += jnp.dot(x_ref[...], w_ref[...],
                            preferred_element_type=jnp.float32)   # MXU

    @pl.when(k == pl.num_programs(2) - 1)
    def _():
        z = omega_0 * (acc_ref[...] + b_ref[...])                 # VPU
        o_ref[...] = jnp.sin(z).astype(o_ref.dtype)               # EUP


def _sine_kernel_with_intermediate(x_ref, w_ref, b_ref, o_ref, z_ref, acc_ref,
                                   *, omega_0: float):
    """Same as above but also writes the pre-activation z."""
    k = pl.program_id(2)

    @pl.when(k == 0)
    def _():
        acc_ref[...] = jnp.zeros_like(acc_ref)

    acc_ref[...] += jnp.dot(x_ref[...], w_ref[...],
                            preferred_element_type=jnp.float32)

    @pl.when(k == pl.num_programs(2) - 1)
    def _():
        z = omega_0 * (acc_ref[...] + b_ref[...])
        z_ref[...] = z.astype(z_ref.dtype)
        o_ref[...] = jnp.sin(z).astype(o_ref.dtype)


# ----------------------------------------------------------------------------
# Wrapper
# ----------------------------------------------------------------------------
def _sine_layer_call(x2d, w, b, *, omega_0, with_intermediate,
                     tm=256, tn=512, tk=512):
    B, K = x2d.shape
    K2, N = w.shape
    assert K == K2, (K, K2)

    # Pad to hardware tiles (8 sublanes / 128 lanes), then to whole grid tiles.
    Bp = _round_up(B, 8)
    Kp = _round_up(K, 128)
    Np = _round_up(N, 128)

    TM = min(tm, Bp)
    TK = min(tk, Kp)
    TN = min(tn, Np)
    Bp = _round_up(Bp, TM)
    Kp = _round_up(Kp, TK)
    Np = _round_up(Np, TN)

    xp = jnp.pad(x2d, ((0, Bp - B), (0, Kp - K)))
    wp = jnp.pad(w, ((0, Kp - K), (0, Np - N)))
    bp = jnp.pad(b.reshape(1, N), ((0, 0), (0, Np - N)))

    grid = (Bp // TM, Np // TN, Kp // TK)

    in_specs = [
        pl.BlockSpec((TM, TK), lambda i, j, k: (i, k)),   # activations
        pl.BlockSpec((TK, TN), lambda i, j, k: (k, j)),   # weights (pipelined DMA)
        pl.BlockSpec((1, TN), lambda i, j, k: (0, j)),    # bias tracks N tile
    ]
    out_block = pl.BlockSpec((TM, TN), lambda i, j, k: (i, j))
    compiler_params = pltpu.CompilerParams(
        dimension_semantics=("parallel", "parallel", "arbitrary"))
    scratch_shapes = [pltpu.VMEM((TM, TN), jnp.float32)]

    if with_intermediate:
        out = pl.pallas_call(
            functools.partial(_sine_kernel_with_intermediate,
                              omega_0=float(omega_0)),
            out_shape=(jax.ShapeDtypeStruct((Bp, Np), jnp.float32),
                       jax.ShapeDtypeStruct((Bp, Np), jnp.float32)),
            grid=grid,
            in_specs=in_specs,
            out_specs=(out_block, out_block),
            scratch_shapes=scratch_shapes,
            compiler_params=compiler_params,
        )(xp, wp, bp)
        return out[0][:B, :N], out[1][:B, :N]

    out = pl.pallas_call(
        functools.partial(_sine_kernel, omega_0=float(omega_0)),
        out_shape=jax.ShapeDtypeStruct((Bp, Np), jnp.float32),
        grid=grid,
        in_specs=in_specs,
        out_specs=out_block,
        scratch_shapes=scratch_shapes,
        compiler_params=compiler_params,
    )(xp, wp, bp)
    return out[:B, :N]


def sine_layer_forward(x, w, b, *, omega_0: float = 30.0):
    """sin(omega_0 * (x @ W + b)).  x: (..., In), w: (In, Out), b: (Out,)."""
    lead = x.shape[:-1]
    x2d = x.reshape(-1, x.shape[-1])
    out = _sine_layer_call(x2d, w, b, omega_0=omega_0, with_intermediate=False)
    return out.reshape(*lead, w.shape[1])


def sine_layer_forward_with_intermediate(x, w, b, *, omega_0: float = 30.0):
    """Returns (sin(z), z) with z = omega_0 * (x @ W + b)."""
    lead = x.shape[:-1]
    x2d = x.reshape(-1, x.shape[-1])
    s, z = _sine_layer_call(x2d, w, b, omega_0=omega_0, with_intermediate=True)
    return (s.reshape(*lead, w.shape[1]), z.reshape(*lead, w.shape[1]))


# ----------------------------------------------------------------------------
# SIREN-style deterministic init (weights stored as (in_features, out_features))
# ----------------------------------------------------------------------------
def init_sine_layer(key, in_features, out_features, *, is_first=False, omega_0=30.0):
    kw, kb = jax.random.split(key)
    if is_first:
        w_bound = 1.0 / in_features
    else:
        w_bound = float(np.sqrt(6.0 / in_features) / omega_0)
    b_bound = 1.0 / float(np.sqrt(in_features))   # nn.Linear default bias init
    w = jax.random.uniform(kw, (in_features, out_features), jnp.float32,
                           minval=-w_bound, maxval=w_bound)
    b = jax.random.uniform(kb, (out_features,), jnp.float32,
                           minval=-b_bound, maxval=b_bound)
    return w, b


# Pure-JAX reference for correctness checking.
def _reference_forward(x, w, b, omega_0):
    z = omega_0 * (x @ w + b)
    return jnp.sin(z), z


if __name__ == "__main__":
    # Small, deterministic, tile-aligned example (batch multiple of 8 sublanes,
    # features multiples of 128 lanes -> fully populated vregs / MXU passes).
    batch = 64
    in_features = 128
    out_features = 256
    omega_0 = 30.0

    key = jax.random.PRNGKey(0)
    key, kx = jax.random.split(key)
    x = jax.random.normal(kx, (batch, in_features), jnp.float32)
    w, b = init_sine_layer(key, in_features, out_features,
                           is_first=False, omega_0=omega_0)

    out = sine_layer_forward(x, w, b, omega_0=omega_0)
    out = jax.block_until_ready(out)

    sin_ref, z_ref = _reference_forward(x, w, b, omega_0)
    assert out.shape == (batch, out_features), out.shape
    assert jnp.allclose(out, sin_ref, atol=1e-4, rtol=1e-4), "forward mismatch"

    out_s, out_z = sine_layer_forward_with_intermediate(x, w, b, omega_0=omega_0)
    out_s = jax.block_until_ready(out_s)
    out_z = jax.block_until_ready(out_z)
    assert jnp.allclose(out_s, sin_ref, atol=1e-4, rtol=1e-4), "sin mismatch"
    assert jnp.allclose(out_z, z_ref, atol=1e-3, rtol=1e-4), "intermediate mismatch"

    print("KERNEL_OK")
</pallas_src>

<mosaic_0001>
module attributes {stable_mosaic.version = 11 : i64} {
  func.func @_sine_kernel(%arg0: i32, %arg1: i32, %arg2: i32, %arg3: memref<64x128xf32, #tpu.memory_space<vmem>>, %arg4: memref<128x256xf32, #tpu.memory_space<vmem>>, %arg5: memref<1x256xf32, #tpu.memory_space<vmem>>, %arg6: memref<64x256xf32, #tpu.memory_space<vmem>>, %arg7: memref<64x256xf32, #tpu.memory_space<vmem>>) attributes {dimension_semantics = [#tpu.dimension_semantics<parallel>, #tpu.dimension_semantics<parallel>, #tpu.dimension_semantics<arbitrary>], iteration_bounds = array<i64: 1, 1, 1>, scalar_prefetch = 0 : i64, scratch_operands = 1 : i64, tpu.core_type = #tpu.core_type<tc>, window_params = [{transform_indices = @transform_0, window_bounds = array<i64: 64, 128>}, {transform_indices = @transform_1, window_bounds = array<i64: 128, 256>}, {transform_indices = @transform_2, window_bounds = array<i64: 1, 256>}, {transform_indices = @transform_3, window_bounds = array<i64: 64, 256>}]} {
    %c0_i32 = arith.constant 0 : i32
    %0 = arith.cmpi eq, %arg2, %c0_i32 : i32
    %1 = arith.extui %0 : i1 to i32
    %c0_i32_0 = arith.constant 0 : i32
    %2 = arith.cmpi ne, %1, %c0_i32_0 : i32
    scf.if %2 {
      %cst_10 = arith.constant 0.000000e+00 : f32
      %12 = vector.broadcast %cst_10 : f32 to vector<64x256xf32>
      %c0_11 = arith.constant 0 : index
      %c0_12 = arith.constant 0 : index
      %13 = vector.load %arg7[%c0_11, %c0_12] : memref<64x256xf32, #tpu.memory_space<vmem>>, vector<64x256xf32>
      tpu.vector_store %arg7[%c0_11, %c0_12], %12 {strides = array<i32>} : memref<64x256xf32, #tpu.memory_space<vmem>>, vector<64x256xf32>,
    } else {
    }
    %c0 = arith.constant 0 : index
    %c0_1 = arith.constant 0 : index
    %3 = vector.load %arg7[%c0, %c0_1] : memref<64x256xf32, #tpu.memory_space<vmem>>, vector<64x256xf32>
    %c0_2 = arith.constant 0 : index
    %c0_3 = arith.constant 0 : index
    %4 = vector.load %arg3[%c0_2, %c0_3] : memref<64x128xf32, #tpu.memory_space<vmem>>, vector<64x128xf32>
    %c0_4 = arith.constant 0 : index
    %c0_5 = arith.constant 0 : index
    %5 = vector.load %arg4[%c0_4, %c0_5] : memref<128x256xf32, #tpu.memory_space<vmem>>, vector<128x256xf32>
    %cst = arith.constant dense<0.000000e+00> : vector<64x256xf32>
    %6 = tpu.matmul %4, %5, %cst {dimension_numbers = #tpu.dot_dimension_numbers<[1], [0], [0], [1], [0, 0, 1, 1], [], []>} : vector<64x128xf32>, vector<128x256xf32>, vector<64x256xf32> -> vector<64x256xf32>
    %7 = arith.addf %3, %6 : vector<64x256xf32>
    %c0_6 = arith.constant 0 : index
    %c0_7 = arith.constant 0 : index
    %8 = vector.load %arg7[%c0_6, %c0_7] : memref<64x256xf32, #tpu.memory_space<vmem>>, vector<64x256xf32>
    tpu.vector_store %arg7[%c0_6, %c0_7], %7 {strides = array<i32>} : memref<64x256xf32, #tpu.memory_space<vmem>>, vector<64x256xf32>,
    %c0_i32_8 = arith.constant 0 : i32
    %9 = arith.cmpi eq, %arg2, %c0_i32_8 : i32
    %10 = arith.extui %9 : i1 to i32
    %c0_i32_9 = arith.constant 0 : i32
    %11 = arith.cmpi ne, %10, %c0_i32_9 : i32
    scf.if %11 {
      %c0_10 = arith.constant 0 : index
      %c0_11 = arith.constant 0 : index
      %12 = vector.load %arg7[%c0_10, %c0_11] : memref<64x256xf32, #tpu.memory_space<vmem>>, vector<64x256xf32>
      %c0_12 = arith.constant 0 : index
      %c0_13 = arith.constant 0 : index
      %13 = vector.load %arg5[%c0_12, %c0_13] : memref<1x256xf32, #tpu.memory_space<vmem>>, vector<1x256xf32>
      %14 = vector.broadcast %13 : vector<1x256xf32> to vector<64x256xf32>
      %15 = arith.addf %12, %14 : vector<64x256xf32>
      %cst_14 = arith.constant 3.000000e+01 : f32
      %16 = vector.broadcast %cst_14 : f32 to vector<64x256xf32>
      %17 = arith.mulf %16, %15 : vector<64x256xf32>
      %18 = math.sin %17 : vector<64x256xf32>
      %c0_15 = arith.constant 0 : index
      %c0_16 = arith.constant 0 : index
      %19 = vector.load %arg6[%c0_15, %c0_16] : memref<64x256xf32, #tpu.memory_space<vmem>>, vector<64x256xf32>
      tpu.vector_store %arg6[%c0_15, %c0_16], %18 {strides = array<i32>} : memref<64x256xf32, #tpu.memory_space<vmem>>, vector<64x256xf32>,
    } else {
    }
    return
  }
  func.func @transform_0(%arg0: i32, %arg1: i32, %arg2: i32) -> (i32, i32) {
    %c0_i32 = arith.constant 0 : i32
    return %arg0, %arg2 : i32, i32
  }
  func.func @transform_1(%arg0: i32, %arg1: i32, %arg2: i32) -> (i32, i32) {
    %c0_i32 = arith.constant 0 : i32
    return %arg2, %arg1 : i32, i32
  }
  func.func @transform_2(%arg0: i32, %arg1: i32, %arg2: i32) -> (i32, i32) {
    %c0_i32 = arith.constant 0 : i32
    %c0_i32_0 = arith.constant 0 : i32
    return %c0_i32, %arg1 : i32, i32
  }
  func.func @transform_3(%arg0: i32, %arg1: i32, %arg2: i32) -> (i32, i32) {
    %c0_i32 = arith.constant 0 : i32
    return %arg0, %arg1 : i32, i32
  }
}

</mosaic_0001>

<bundles_post_ra>
// kernel: tpu_custom_call.1
= control target key start
LH: loop header
LB: loop body
LE: loop exit
PB: predicated region body
PF: predicated region fallthrough
CT: control target
= control target key end

     0   :  { %8 = vsyncpa [#allocation4], 0  ;;  %s3661_s0 = inlined_call_operand.hbm [shape: f32[64,128], index: 0, kind: input, shape index: {}]   ;;  %s3662_s1 = inlined_call_operand.hbm [shape: f32[128,256], index: 1, kind: input, shape index: {}]   ;;  %s3663_s2 = inlined_call_operand.vmem [shape: f32[1,256], index: 2, kind: input, shape index: {}]   ;;  %s3664_s3 = inlined_call_operand.hbm [shape: f32[64,256], index: 3, kind: output, shape index: {}]  }
   0x1   :  { %9 = vsyncpa [#allocation7], 0 }
   0x2   :  { %10 = vsyncpa [#allocation5], 0  ;;  %s2329_s12 = smov [#allocation3]  }
   0x3   :  { %s16_s13 = sshll.u32 %s2329_s12, 4  ;;  %s17_s13 = int_to_ptr.vmem [resolvable:$true] %s16_s13 }
   0x4   :  { %s2271_s14 = scalar_lea.vmem %s17_s13, 1024  ;;  %p2276_p1 = scmp.lt.s32.totalorder %s17_s13, %s17_s13 }
   0x5   :  { %p2272_p0 = scmp.ne.s32.totalorder %s17_s13, %s2271_s14  ;;  %p2277_p2 = scmp.lt.s32.totalorder %s2271_s14, %s2271_s14 }
   0x7   :  { %p2278_p3 = por %p2277_p2, %p2276_p1 }
   0x9   :  { %p2279_p4 = pnand %p2278_p3, %p2272_p0 }
   0xb   :  { %2282 = shalt.err (!%p2279_p4)
}
   0xc   :  { %s2330_s15 = smov 128   ;;  %s2331_s16 = smov 8  }
   0xd   :  { %22 = dma.hbm_to_vmem [thread:$0]  %s3661_s0, 1024, %s17_s13, [#allocation4], %s2330_s15, %s2330_s15, %s2331_s16  }
   0xe   :  { %s2332_s19 = smov [#allocation6]  }
   0xf   :  { %s28_s20 = sshll.u32 %s2332_s19, 4  ;;  %s29_s20 = int_to_ptr.vmem [resolvable:$true] %s28_s20 }
  0x10   :  { %s2291_s21 = scalar_lea.vmem %s29_s20, 4096  ;;  %p2296_p6 = scmp.lt.s32.totalorder %s29_s20, %s29_s20 }
  0x11   :  { %p2292_p5 = scmp.ne.s32.totalorder %s29_s20, %s2291_s21  ;;  %p2297_p7 = scmp.lt.s32.totalorder %s2291_s21, %s2291_s21 }
  0x13   :  { %p2298_p8 = por %p2297_p7, %p2296_p6 }
  0x15   :  { %p2299_p9 = pnand %p2298_p8, %p2292_p5 }
  0x17   :  { %2302 = shalt.err (!%p2299_p9)
}
  0x18   :  { %s2333_s22 = smov 256   ;;  %s2334_s23 = smov 16  }
  0x19   :  { %34 = dma.hbm_to_vmem [thread:$0]  %s3662_s1, 4096, %s29_s20, [#allocation7], %s2333_s22, %s2333_s22, %s2334_s23  }
  0x1a   :  { %2323 = dma.done.wait [#allocation4], 1024  }
  0x1b   :  { %2324 = vsyncadd [#allocation4], 4294966272 }
  0x1c   :  { %2325 = dma.done.wait [#allocation7], 4096  }
  0x1d   :  { %2326 = vsyncadd [#allocation7], 4294963200  ;;  %v2335_v0 = vmov 0.0   ;;  %v118_v1 = vld [vmem:[#allocation6 + $0xf8] sm:$0xff]  ;;  %v117_v2 = vld [vmem:[#allocation6 + $0xf0] sm:$0xff]  ;;  %v285_v41 = vlaneseq }
  0x1e   :  { %183 = vmatprep.mubr.f32.mxu0 %v2335_v0  ;;  %207 = vmatprep.mubr.f32.mxu1 %v2335_v0  ;;  %v116_v3 = vld [vmem:[#allocation6 + $0xe8] sm:$0xff]  ;;  %v115_v4 = vld [vmem:[#allocation6 + $0xe0] sm:$0xff]  ;;  %v114_v5 = vld [vmem:[#allocation6 + $0xd8] sm:$0xff] }
  0x1f   :  { %119 = vmatprep.subr.mxu0 %v118_v1  ;;  %2089 = vmatprep.subr.mxu1 %v118_v1  ;;  %v113_v6 = vld [vmem:[#allocation6 + $0xd0] sm:$0xff]  ;;  %v112_v7 = vld [vmem:[#allocation6 + $0xc8] sm:$0xff]  ;;  %v111_v8 = vld [vmem:[#allocation6 + $0xc0] sm:$0xff]  ;;  %v286_v42 = vshrl.u32 %v285_v41, 7 }
  0x20   :  { %120 = vmatpush1.msra.mxu0 %v117_v2  ;;  %2105 = vmatpush1.msra.mxu1 %v117_v2  ;;  %v110_v9 = vld [vmem:[#allocation6 + $0xb8] sm:$0xff]  ;;  %v109_v10 = vld [vmem:[#allocation6 + $0xb0] sm:$0xff]  ;;  %v108_v11 = vld [vmem:[#allocation6 + $0xa8] sm:$0xff] }
  0x21   :  { %121 = vmatprep.subr.mxu0 %v116_v3  ;;  %2090 = vmatprep.subr.mxu1 %v116_v3  ;;  %v107_v12 = vld [vmem:[#allocation6 + $0xa0] sm:$0xff]  ;;  %v106_v13 = vld [vmem:[#allocation6 + $0x98] sm:$0xff]  ;;  %v105_v14 = vld [vmem:[#allocation6 + $0x90] sm:$0xff]  ;;  %v287_v43 = vsub.s32 0, %v286_v42  ;;  %v291_v45 = vsub.s32 1, %v286_v42 }
  0x22   :  { %122 = vmatpush1.msra.mxu0 %v115_v4  ;;  %2106 = vmatpush1.msra.mxu1 %v115_v4  ;;  %v104_v15 = vld [vmem:[#allocation6 + $0x88] sm:$0xff]  ;;  %v103_v16 = vld [vmem:[#allocation6 + $0x80] sm:$0xff]  ;;  %v102_v17 = vld [vmem:[#allocation6 + $0x78] sm:$0xff] }
  0x23   :  { %123 = vmatprep.subr.mxu0 %v114_v5  ;;  %2091 = vmatprep.subr.mxu1 %v114_v5  ;;  %v101_v18 = vld [vmem:[#allocation6 + $0x70] sm:$0xff]  ;;  %v100_v19 = vld [vmem:[#allocation6 + $0x68] sm:$0xff]  ;;  %v99_v20 = vld [vmem:[#allocation6 + $0x60] sm:$0xff] }
  0x24   :  { %124 = vmatpush1.msra.mxu0 %v113_v6  ;;  %2107 = vmatpush1.msra.mxu1 %v113_v6  ;;  %v98_v21 = vld [vmem:[#allocation6 + $0x58] sm:$0xff]  ;;  %v97_v22 = vld [vmem:[#allocation6 + $0x50] sm:$0xff]  ;;  %v96_v23 = vld [vmem:[#allocation6 + $0x48] sm:$0xff] }
  0x25   :  { %125 = vmatprep.subr.mxu0 %v112_v7  ;;  %2092 = vmatprep.subr.mxu1 %v112_v7  ;;  %v95_v24 = vld [vmem:[#allocation6 + $0x40] sm:$0xff]  ;;  %v94_v25 = vld [vmem:[#allocation6 + $0x38] sm:$0xff]  ;;  %v93_v26 = vld [vmem:[#allocation6 + $0x30] sm:$0xff] }
  0x26   :  { %126 = vmatpush1.msra.mxu0 %v111_v8  ;;  %2108 = vmatpush1.msra.mxu1 %v111_v8  ;;  %v92_v27 = vld [vmem:[#allocation6 + $0x28] sm:$0xff]  ;;  %v91_v28 = vld [vmem:[#allocation6 + $0x20] sm:$0xff]  ;;  %v90_v29 = vld [vmem:[#allocation6 + $0x18] sm:$0xff] }
  0x27   :  { %127 = vmatprep.subr.mxu0 %v110_v9  ;;  %2093 = vmatprep.subr.mxu1 %v110_v9  ;;  %v89_v30 = vld [vmem:[#allocation6 + $0x10] sm:$0xff]  ;;  %v88_v31 = vld [vmem:[#allocation6 + $0x8] sm:$0xff]  ;;  %v87_v32 = vld [vmem:[#allocation6] sm:$0xff] }
  0x28   :  { %128 = vmatpush1.msra.mxu0 %v109_v10  ;;  %2109 = vmatpush1.msra.mxu1 %v109_v10  ;;  %v79_v33 = vld [vmem:[#allocation3] sm:$0xff]  ;;  %v80_v35 = vld [vmem:[#allocation3 + $0x8] sm:$0xff]  ;;  %v81_v37 = vld [vmem:[#allocation3 + $0x10] sm:$0xff] }
  0x29   :  { %129 = vmatprep.subr.mxu0 %v108_v11  ;;  %2094 = vmatprep.subr.mxu1 %v108_v11  ;;  %v83_v34 = vld [vmem:[#allocation3 + $0x20] sm:$0xff]  ;;  %v84_v36 = vld [vmem:[#allocation3 + $0x28] sm:$0xff]  ;;  %v85_v38 = vld [vmem:[#allocation3 + $0x30] sm:$0xff] }
  0x2a   :  { %130 = vmatpush1.msra.mxu0 %v107_v12  ;;  %2110 = vmatpush1.msra.mxu1 %v107_v12  ;;  %v82_v39 = vld [vmem:[#allocation3 + $0x18] sm:$0xff]  ;;  %v283_v44 = vld [vmem:[%s3663_s2] sm:$0x3]  ;;  %s2342_s2 = smov [#allocation8]  }
  0x2b   :  { %131 = vmatprep.subr.mxu0 %v106_v13  ;;  %2095 = vmatprep.subr.mxu1 %v106_v13  ;;  %v86_v40 = vld [vmem:[#allocation3 + $0x38] sm:$0xff]  ;;  %v2383_v46 = vrot.slane %v283_v44, %v287_v43  ;;  %v2385_v47 = vrot.slane %v283_v44, %v291_v45  ;;  %s2012_s26 = sshll.u32 %s2342_s2, 4  ;;  %s2013_s26 = int_to_ptr.vmem [resolvable:$true] %s2012_s26 }
  0x2c   :  { %132 = vmatpush1.msra.mxu0 %v105_v14  ;;  %2111 = vmatpush1.msra.mxu1 %v105_v14  ;;  %s2303_s27 = scalar_lea.vmem %s2013_s26, 2048  ;;  %p2308_p11 = scmp.lt.s32.totalorder %s2013_s26, %s2013_s26 }
  0x2d   :  { %133 = vmatprep.subr.mxu0 %v104_v15  ;;  %2096 = vmatprep.subr.mxu1 %v104_v15  ;;  %p2304_p10 = scmp.ne.s32.totalorder %s2013_s26, %s2303_s27  ;;  %p2309_p12 = scmp.lt.s32.totalorder %s2303_s27, %s2303_s27 }
  0x2e   :  { %134 = vmatpush1.msra.mxu0 %v103_v16  ;;  %2112 = vmatpush1.msra.mxu1 %v103_v16 }
  0x2f   :  { %135 = vmatprep.subr.mxu0 %v102_v17  ;;  %2097 = vmatprep.subr.mxu1 %v102_v17  ;;  %p2310_p13 = por %p2309_p12, %p2308_p11 }
  0x30   :  { %136 = vmatpush1.msra.mxu0 %v101_v18  ;;  %2113 = vmatpush1.msra.mxu1 %v101_v18 }
  0x31   :  { %137 = vmatprep.subr.mxu0 %v100_v19  ;;  %2098 = vmatprep.subr.mxu1 %v100_v19  ;;  %p2311_p0 = pnand %p2310_p13, %p2304_p10 }
  0x32   :  { %138 = vmatpush1.msra.mxu0 %v99_v20  ;;  %2114 = vmatpush1.msra.mxu1 %v99_v20 }
  0x33   :  { %139 = vmatprep.subr.mxu0 %v98_v21  ;;  %2099 = vmatprep.subr.mxu1 %v98_v21 }
  0x34   :  { %140 = vmatpush1.msra.mxu0 %v97_v22  ;;  %2115 = vmatpush1.msra.mxu1 %v97_v22 }
  0x35   :  { %141 = vmatprep.subr.mxu0 %v96_v23  ;;  %2100 = vmatprep.subr.mxu1 %v96_v23  ;;  %v2336_v23 = vmov 683565275  }
  0x36   :  { %142 = vmatpush1.msra.mxu0 %v95_v24  ;;  %2116 = vmatpush1.msra.mxu1 %v95_v24 }
  0x37   :  { %143 = vmatprep.subr.mxu0 %v94_v25  ;;  %2101 = vmatprep.subr.mxu1 %v94_v25 }
  0x38   :  { %144 = vmatpush1.msra.mxu0 %v93_v26  ;;  %2117 = vmatpush1.msra.mxu1 %v93_v26 }
  0x39   :  { %145 = vmatprep.subr.mxu0 %v92_v27  ;;  %2102 = vmatprep.subr.mxu1 %v92_v27  ;;  %v2337_v27 = vmov 2475754826  }
  0x3a   :  { %146 = vmatpush1.msra.mxu0 %v91_v28  ;;  %2118 = vmatpush1.msra.mxu1 %v91_v28 }
  0x3b   :  { %147 = vmatprep.subr.mxu0 %v90_v29  ;;  %2103 = vmatprep.subr.mxu1 %v90_v29  ;;  %v2338_v29 = vmov 2131351028  }
  0x3c   :  { %148 = vmatpush1.msra.mxu0 %v89_v30  ;;  %2119 = vmatpush1.msra.mxu1 %v89_v30 }
  0x3d   :  { %149 = vmatprep.subr.mxu0 %v88_v31  ;;  %2104 = vmatprep.subr.mxu1 %v88_v31  ;;  %v2339_v31 = vmov 2102212464  }
  0x3e   :  { %150 = vmatpush1.msra.mxu0 %v87_v32  ;;  %2120 = vmatpush1.msra.mxu1 %v87_v32 }
  0x3f   :  { %184 = vmatmul.mubr.f32.vlgmr.msra.gmra.mxu0 %v79_v33  ;;  %208 = vmatmul.mubr.f32.vlgmr.msra.gmra.mxu1 %v83_v34  ;;  %v2340_v33 = vmov 920167782  }
  0x40   :  { %189 = vmatprep.mubr.f32.mxu0 %v2335_v0  ;;  %213 = vmatprep.mubr.f32.mxu1 %v2335_v0 }
  0x43   :  { %190 = vmatmul.mubr.f32.gmra.mxu0 %v80_v35  ;;  %214 = vmatmul.mubr.f32.gmra.mxu1 %v84_v36 }
  0x44   :  { %195 = vmatprep.mubr.f32.mxu0 %v2335_v0  ;;  %219 = vmatprep.mubr.f32.mxu1 %v2335_v0 }
  0x47   :  { %196 = vmatmul.mubr.f32.gmra.mxu0 %v81_v37  ;;  %220 = vmatmul.mubr.f32.gmra.mxu1 %v85_v38 }
  0x48   :  { %201 = vmatprep.mubr.f32.mxu0 %v2335_v0  ;;  %225 = vmatprep.mubr.f32.mxu1 %v2335_v0 }
  0x4b   :  { %202 = vmatmul.mubr.f32.gmra.mxu0 %v82_v39  ;;  %226 = vmatmul.mubr.f32.gmra.mxu1 %v86_v40  ;;  %v2341_v40 = vmov 1326507024  }
  0xff   :  { %v185_v48 = vpop.f32.mrf.mxu0  ;;  %v209_v49 = vpop.f32.mrf.mxu1 }
 0x100   :  { %v295_v50 = vadd.f32 %v2383_v46, %v185_v48  ;;  %v303_v51 = vadd.f32 %v2383_v46, %v209_v49 }
 0x101   :  { %v187_v52 = vpop.f32.mrf.mxu0  ;;  %v211_v1 = vpop.f32.mrf.mxu1 }
 0x102   :  { %v2389_v53 = vmul.f32 30.0, %v295_v50  ;;  %v2391_v54 = vmul.f32 30.0, %v303_v51  ;;  %v296_v55 = vadd.f32 %v2385_v47, %v187_v52  ;;  %v304_v7 = vadd.f32 %v2385_v47, %v211_v1 }
 0x104   :  { %v327_v56 = vand.u32 2147483647, %v2389_v53  ;;  %v330_v57 = vand.u32 2139095040, %v2389_v53  ;;  %v1159_v58 = vand.u32 2147483647, %v2391_v54  ;;  %v1162_v59 = vand.u32 2139095040, %v2391_v54 }
 0x105   :  { %v2400_v62 = vmul.f32 30.0, %v296_v55  ;;  %v2407_v17 = vmul.f32 30.0, %v304_v7  ;;  %vm329_vm13 = vcmp.lt.s32.totalorder %v2389_v53, 0 }
 0x106   :  { %v331_v60 = vshrl.u32 %v330_v57, 23  ;;  %v334_v61 = vand.u32 8388607, %v327_v56  ;;  %v1163_v63 = vshrl.u32 %v1162_v59, 23  ;;  %v1166_v0 = vand.u32 8388607, %v1159_v58 }
 0x107   :  { %v434_v4 = vand.u32 2139095040, %v2400_v62  ;;  %v431_v10 = vand.u32 2147483647, %v2400_v62  ;;  %vm2512_vm14 = vcmp.le.f32.partialorder %v327_v56, 0.7853982 }
 0x108   :  { %v2025_v2 = vadd.s32 4294967169, %v331_v60  ;;  %v2057_v3 = vadd.s32 4294967169, %v1163_v63  ;;  %v335_v5 = vor.u32 8388608, %v334_v61  ;;  %v1167_v8 = vor.u32 8388608, %v1166_v0 }
 0x109   :  { %v435_v11 = vshrl.u32 %v434_v4, 23  ;;  %v2417_v21 = vand.u32 8388607, %v431_v10 }
 0x10a   :  { %v337_v6 = vadd.s32 1, %v2025_v2  ;;  %v1169_v9 = vadd.s32 1, %v2057_v3  ;;  %v2409_v18 = vshll.u32 %v335_v5, 8  ;;  %v2413_v20 = vshll.u32 %v1167_v8, 8 }
 0x10b   :  { %v2029_v13 = vadd.s32 4294967169, %v435_v11 }
 0x10c   :  { %vm338_vm0 = vcmp.gt.s32.totalorder %v337_v6, 0  ;;  %vm1170_vm1 = vcmp.gt.s32.totalorder %v1169_v9, 0 }
 0x10d   :  { %v339_v12 = vsel %vm338_vm0, %v337_v6, 0  ;;  %v1171_v16 = vsel %vm1170_vm1, %v1169_v9, 0  ;;  %v2420_v26 = vadd.s32 1, %v2029_v13 }
 0x10e   :  { %v340_v14 = vshrl.u32 %v339_v12, 5  ;;  %v341_v15 = vand.u32 31, %v339_v12  ;;  %v2411_v19 = vshrl.u32 %v1171_v16, 5  ;;  %v1173_v25 = vand.u32 31, %v1171_v16 }
 0x10f   :  { %vm442_vm11 = vcmp.gt.s32.totalorder %v2420_v26, 0 }
 0x110   :  { %v342_v22 = vsub.s32 32, %v341_v15  ;;  %v344_v24 = vshll.u32 %v2336_v23, %v341_v15  ;;  %v347_v28 = vshll.u32 %v2337_v27, %v341_v15  ;;  %v350_v30 = vshll.u32 %v2338_v29, %v341_v15 }
 0x111   :  { %v353_v32 = vshll.u32 %v2339_v31, %v341_v15  ;;  %v356_v34 = vshll.u32 %v2340_v33, %v341_v15  ;;  %vm359_vm2 = vcmp.lt.s32.totalorder %v340_v14, 1  ;;  %vm360_vm3 = vcmp.lt.s32.totalorder %v340_v14, 2 }
 0x112   :  { %v345_v35 = vshrl.u32 %v2337_v27, %v342_v22  ;;  %v348_v36 = vshrl.u32 %v2338_v29, %v342_v22  ;;  %v351_v37 = vshrl.u32 %v2339_v31, %v342_v22  ;;  %v343_v38 = vshrl.u32 %v2336_v23, %v342_v22 }
 0x113   :  { %v354_v39 = vshrl.u32 %v2340_v33, %v342_v22  ;;  %v357_v41 = vshrl.u32 %v2341_v40, %v342_v22  ;;  %v1174_v45 = vsub.s32 32, %v1173_v25  ;;  %vm361_vm4 = vcmp.lt.s32.totalorder %v340_v14, 3 }
 0x114   :  { %v346_v42 = vor.u32 %v345_v35, %v344_v24  ;;  %v349_v43 = vor.u32 %v348_v36, %v347_v28  ;;  %v352_v44 = vor.u32 %v351_v37, %v350_v30  ;;  %vm362_vm5 = vcmp.lt.s32.totalorder %v340_v14, 4 }
 0x115   :  { %v355_v48 = vor.u32 %v354_v39, %v353_v32  ;;  %v358_v49 = vor.u32 %v357_v41, %v356_v34  ;;  %v1176_v61 = vshll.u32 %v2336_v23, %v1173_v25  ;;  %v1177_v1 = vshrl.u32 %v2337_v27, %v1174_v45 }
 0x116   :  { %v363_v50 = vsel %vm359_vm2, %v343_v38, %v346_v42  ;;  %v364_v51 = vsel %vm362_vm5, %v352_v44, 2102212464  ;;  %v367_v52 = vsel %vm359_vm2, %v346_v42, %v349_v43  ;;  %v371_v55 = vsel %vm359_vm2, %v349_v43, %v352_v44 }
 0x117   :  { %v365_v57 = vsel %vm361_vm4, %v349_v43, %v364_v51  ;;  %v368_v59 = vsel %vm362_vm5, %v355_v48, 920167782  ;;  %v372_v60 = vsel %vm362_vm5, %v358_v49, 1326507024  ;;  %v1179_v2 = vshll.u32 %v2337_v27, %v1173_v25 }
 0x118   :  { %v369_v63 = vsel %vm361_vm4, %v352_v44, %v368_v59  ;;  %v373_v0 = vsel %vm361_vm4, %v355_v48, %v372_v60  ;;  %v366_v3 = vsel %vm360_vm3, %v363_v50, %v365_v57  ;;  %v1180_v6 = vshrl.u32 %v2338_v29, %v1174_v45 }
 0x119   :  { %v370_v4 = vsel %vm360_vm3, %v367_v52, %v369_v63  ;;  %v374_v5 = vsel %vm360_vm3, %v371_v55, %v373_v0  ;;  %v1178_v12 = vor.u32 %v1177_v1, %v1176_v61  ;;  %v1182_v15 = vshll.u32 %v2338_v29, %v1173_v25 }
 0x11a   :  { %v2443_v7 = vmul.u32.u64.low %v2409_v18, %v374_v5  ;;  %v2444_v8 = vmul.u32.u64.high %v2409_v18, %v374_v5, %v2443_v7  ;;  %v2447_v9 = vmul.u32.u64.low %v2409_v18, %v370_v4  ;;  %v2448_v11 = vmul.u32.u64.high %v2409_v18, %v370_v4, %v2447_v9 }
 0x11b   :  { %v1181_v13 = vor.u32 %v1180_v6, %v1179_v2  ;;  %v1183_v16 = vshrl.u32 %v2339_v31, %v1174_v45  ;;  %v1175_v22 = vshrl.u32 %v2336_v23, %v1174_v45  ;;  %v1185_v14 = vshll.u32 %v2339_v31, %v1173_v25 }
 0x11c   :  { %v1186_v24 = vshrl.u32 %v2340_v33, %v1174_v45  ;;  %v1189_v28 = vshrl.u32 %v2341_v40, %v1174_v45  ;;  %v382_v30 = vmul.u32 %v2409_v18, %v366_v3  ;;  %v1188_v34 = vshll.u32 %v2340_v33, %v1173_v25 }
 0x11d   :  { %v1184_v32 = vor.u32 %v1183_v16, %v1182_v15  ;;  %vm1191_vm6 = vcmp.lt.s32.totalorder %v2411_v19, 1  ;;  %vm384_vm7 = vc.u32 %v2444_v8, %v2447_v9  ;;  %v385_v35 = vadd.s32 1, %v2448_v11 }
 0x11e   :  { %v1187_v36 = vor.u32 %v1186_v24, %v1185_v14  ;;  %vm1192_vm8 = vcmp.lt.s32.totalorder %v2411_v19, 2  ;;  %v1190_v37 = vor.u32 %v1189_v28, %v1188_v34  ;;  %vm1193_vm9 = vcmp.lt.s32.totalorder %v2411_v19, 3 }
 0x11f   :  { %vm1194_vm10 = vcmp.lt.s32.totalorder %v2411_v19, 4  ;;  %v1199_v38 = vsel %vm1191_vm6, %v1178_v12, %v1181_v13  ;;  %v386_v18 = vsel %vm384_vm7, %v385_v35, %v2448_v11  ;;  %v1203_v25 = vsel %vm1191_vm6, %v1181_v13, %v1184_v32 }
 0x120   :  { %v1196_v39 = vsel %vm1194_vm10, %v1184_v32, 2102212464  ;;  %v1200_v41 = vsel %vm1194_vm10, %v1187_v36, 920167782  ;;  %v387_v42 = vadd.s32 %v386_v18, %v382_v30  ;;  %v1195_v43 = vsel %vm1191_vm6, %v1175_v22, %v1178_v12 }
 0x121   :  { %v1201_v44 = vsel %vm1193_vm9, %v1184_v32, %v1200_v41  ;;  %v1204_v45 = vsel %vm1194_vm10, %v1190_v37, 1326507024  ;;  %v1197_v48 = vsel %vm1193_vm9, %v1181_v13, %v1196_v39  ;;  %v443_v61 = vsel %vm442_vm11, %v2420_v26, 0 }
 0x122   :  { %v1202_v49 = vsel %vm1192_vm8, %v1199_v38, %v1201_v44  ;;  %v1205_v50 = vsel %vm1193_vm9, %v1187_v36, %v1204_v45  ;;  %v388_v51 = vadd.s32 536870912, %v387_v42  ;;  %v1198_v0 = vsel %vm1192_vm8, %v1195_v43, %v1197_v48 }
 0x123   :  { %v1206_v52 = vsel %vm1192_vm8, %v1203_v25, %v1205_v50  ;;  %v2471_v55 = vmul.u32.u64.low %v2413_v20, %v1202_v49  ;;  %v2472_v57 = vmul.u32.u64.high %v2413_v20, %v1202_v49, %v2471_v55  ;;  %v445_v1 = vand.u32 31, %v443_v61 }
 0x124   :  { %v2476_v59 = vmul.u32.u64.low %v2413_v20, %v1206_v52  ;;  %v2477_v60 = vmul.u32.u64.high %v2413_v20, %v1206_v52, %v2476_v59  ;;  %v389_v63 = vshrl.u32 %v388_v51, 30  ;;  %v1266_v2 = vand.u32 2139095040, %v2407_v17 }
 0x125   :  { %v1217_v4 = vadd.s32 1, %v2472_v57  ;;  %v439_v5 = vor.u32 8388608, %v2417_v21  ;;  %v1214_v6 = vmul.u32 %v2413_v20, %v1198_v0  ;;  %v446_v7 = vsub.s32 32, %v445_v1 }
 0x126   :  { %v390_v3 = vshll.u32 %v389_v63, 30  ;;  %vm1216_vm12 = vc.u32 %v2477_v60, %v2471_v55  ;;  %v1267_v19 = vshrl.u32 %v1266_v2, 23  ;;  %v383_v13 = vadd.s32 %v2447_v9, %v2444_v8 }
 0x127   :  { %v1218_v26 = vsel %vm1216_vm12, %v1217_v4, %v2472_v57  ;;  %v2494_v16 = vshll.u32 %v439_v5, 8  ;;  %v1263_v20 = vand.u32 2147483647, %v2407_v17  ;;  %v2497_v22 = vshrl.u32 %v443_v61, 5 }
 0x128   :  { %v2488_v11 = vsub.s32 %v387_v42, %v390_v3  ;;  %v1219_v12 = vadd.s32 %v1218_v26, %v1214_v6  ;;  %v449_v14 = vshrl.u32 %v2337_v27, %v446_v7  ;;  %v452_v24 = vshrl.u32 %v2338_v29, %v446_v7 }
 0x129   :  { %v455_v30 = vshrl.u32 %v2339_v31, %v446_v7  ;;  %v458_v32 = vshrl.u32 %v2340_v33, %v446_v7  ;;  %v2504_v8 = vadd.s32 4294967169, %v1267_v19  ;;  %v413_v9 = vsub.s32 4, %v389_v63 }
 0x12a   :  { %v393_v15 = vsub.s32 0, %v2488_v11  ;;  %v1220_v21 = vadd.s32 536870912, %v1219_v12  ;;  %v448_v35 = vshll.u32 %v2336_v23, %v445_v1  ;;  %v451_v36 = vshll.u32 %v2337_v27, %v445_v1 }
 0x12b   :  { %v454_v18 = vshll.u32 %v2338_v29, %v445_v1  ;;  %v457_v39 = vshll.u32 %v2339_v31, %v445_v1  ;;  %v461_v41 = vshrl.u32 %v2341_v40, %v446_v7  ;;  %v2522_v44 = vand.u32 8388607, %v1263_v20 }
 0x12c   :  { %v2026_v28 = vmin.u32 %v393_v15, %v2488_v11  ;;  %v2506_v34 = vshrl.u32 %v1220_v21, 30  ;;  %v450_v42 = vor.u32 %v449_v14, %v448_v35  ;;  %v453_v43 = vor.u32 %v452_v24, %v451_v36 }
 0x12d   :  { %v456_v56 = vor.u32 %v455_v30, %v454_v18  ;;  %v459_v48 = vor.u32 %v458_v32, %v457_v39  ;;  %v460_v49 = vshll.u32 %v2340_v33, %v445_v1  ;;  %v414_v50 = vsel %vm329_vm13, %v413_v9, %v389_v63 }
 0x12e   :  { %v395_v38 = vclz %v2026_v28  ;;  %v1222_v25 = vshll.u32 %v2506_v34, 30  ;;  %v447_v52 = vshrl.u32 %v2336_v23, %v446_v7  ;;  %vm463_vm15 = vcmp.lt.s32.totalorder %v2497_v22, 1 }
 0x12f   :  { %v462_v57 = vor.u32 %v461_v41, %v460_v49  ;;  %vm464_vm1 = vcmp.lt.s32.totalorder %v2497_v22, 2  ;;  %vm465_vm2 = vcmp.lt.s32.totalorder %v2497_v22, 3  ;;  %vm1161_vm3 = vcmp.lt.s32.totalorder %v2391_v54, 0 }
 0x130   :  { %v2027_v45 = vadd.s32 4294967294, %v395_v38  ;;  %v2527_v51 = vsub.s32 %v1219_v12, %v1222_v25  ;;  %vm466_vm4 = vcmp.lt.s32.totalorder %v2497_v22, 4  ;;  %v471_v63 = vsel %vm463_vm15, %v450_v42, %v453_v43 }
 0x131   :  { %v468_v2 = vsel %vm466_vm4, %v456_v56, 2102212464  ;;  %v472_v3 = vsel %vm466_vm4, %v459_v48, 920167782  ;;  %v475_v7 = vsel %vm463_vm15, %v453_v43, %v456_v56  ;;  %v476_v15 = vsel %vm466_vm4, %v462_v57, 1326507024 }
 0x132   :  { %vm2028_vm0 = vcmp.lt.s32.totalorder %v2027_v45, 0  ;;  %v1225_v61 = vsub.s32 0, %v2527_v51  ;;  %v473_v6 = vsel %vm465_vm2, %v456_v56, %v472_v3  ;;  %v416_v21 = vsel %vm2512_vm14, 0, %v414_v50 }
 0x133   :  { %v398_v59 = vsel %vm2028_vm0, 0, %v2027_v45  ;;  %v474_v12 = vsel %vm464_vm1, %v471_v63, %v473_v6  ;;  %vm2550_vm5 = vcmp.le.f32.partialorder %v1159_v58, 0.7853982  ;;  %v467_v24 = vsel %vm463_vm15, %v447_v52, %v450_v42 }
 0x134   :  { %v399_v0 = vsub.s32 32, %v398_v59  ;;  %v403_v1 = vsub.s32 4294967266, %v398_v59  ;;  %v400_v4 = vshll.u32 %v2488_v11, %v398_v59  ;;  %v2058_v5 = vmin.u32 %v1225_v61, %v2527_v51 }
 0x135   :  { %v1245_v32 = vsub.s32 4, %v2506_v34  ;;  %v477_v9 = vsel %vm465_vm2, %v459_v48, %v476_v15  ;;  %v2564_v36 = vmul.u32.u64.low %v2494_v16, %v474_v12  ;;  %v2565_v38 = vmul.u32.u64.high %v2494_v16, %v474_v12, %v2564_v36 }
 0x136   :  { %v401_v26 = vshrl.u32 %v383_v13, %v399_v0  ;;  %v404_v19 = vadd.s32 127, %v403_v1  ;;  %v1227_v14 = vclz %v2058_v5  ;;  %v469_v13 = vsel %vm465_vm2, %v453_v43, %v468_v2  ;;  %v191_v1 = vpop.f32.mrf.mxu0 }
 0x137   :  { %v478_v58 = vsel %vm464_vm1, %v475_v7, %v477_v9  ;;  %v470_v39 = vsel %vm464_vm1, %v467_v24, %v469_v13  ;;  %v420_v42 = vadd.s32 3, %v416_v21  ;;  %v1215_v43 = vadd.s32 %v2471_v55, %v2477_v60  ;;  %v215_v9 = vpop.f32.mrf.mxu1 }
 0x138   :  { %v402_v28 = vor.u32 %v401_v26, %v400_v4  ;;  %v405_v30 = vshll.u32 %v404_v19, 23  ;;  %v2059_v35 = vadd.s32 4294967294, %v1227_v14  ;;  %v1273_v45 = vadd.s32 1, %v2504_v8 }
 0x139   :  { %v2571_v41 = vmul.u32.u64.low %v2494_v16, %v478_v58  ;;  %v2572_v25 = vmul.u32.u64.high %v2494_v16, %v478_v58, %v2571_v41  ;;  %v1246_v50 = vsel %vm1161_vm3, %v1245_v32, %v2506_v34  ;;  %v486_v57 = vmul.u32 %v2494_v16, %v470_v39 }
 0x13a   :  { %v406_v18 = vor.u32 4788187, %v405_v30  ;;  %vm2060_vm6 = vcmp.lt.s32.totalorder %v2059_v35, 0  ;;  %v409_v48 = vcvt.s32.f32 %v402_v28  ;;  %v489_v59 = vadd.s32 1, %v2565_v38 }
 0x13b   :  { %v1230_v49 = vsel %vm2060_vm6, 0, %v2059_v35  ;;  %vm488_vm7 = vc.u32 %v2572_v25, %v2564_v36  ;;  %vm1274_vm8 = vcmp.gt.s32.totalorder %v1273_v45, 0  ;;  %v1248_v2 = vsel %vm2550_vm5, 0, %v1246_v50 }
 0x13c   :  { %v407_v56 = vand.u32 2147483647, %v406_v18  ;;  %v1231_v22 = vsub.s32 32, %v1230_v49  ;;  %v1235_v52 = vsub.s32 4294967266, %v1230_v49  ;;  %v1232_v63 = vshll.u32 %v2527_v51, %v1230_v49 }
 0x13d   :  { %v490_v8 = vsel %vm488_vm7, %v489_v59, %v2565_v38  ;;  %v1275_v0 = vsel %vm1274_vm8, %v1273_v45, 0  ;;  %v297_v26 = vadd.f32 %v2383_v46, %v191_v1  ;;  %v2594_v12 = vand.u32 3, %v420_v42 }
 0x13e   :  { %v410_v61 = vmul.f32 %v409_v48, %v407_v56  ;;  %v1233_v55 = vshrl.u32 %v1215_v43, %v1231_v22  ;;  %v1236_v60 = vadd.s32 127, %v1235_v52  ;;  %v491_v16 = vadd.s32 %v490_v8, %v486_v57 }
 0x13f   :  { %v1277_v3 = vand.u32 31, %v1275_v0  ;;  %v1252_v21 = vadd.s32 3, %v1248_v2  ;;  %v1271_v24 = vor.u32 8388608, %v2522_v44  ;;  %v2602_v35 = vshrl.u32 %v1275_v0, 5 }
 0x140   :  { %v411_v34 = vxor.u32 2147483648, %v410_v61  ;;  %v1234_v4 = vor.u32 %v1233_v55, %v1232_v63  ;;  %v1237_v5 = vshll.u32 %v1236_v60, 23  ;;  %v492_v6 = vadd.s32 536870912, %v491_v16 }
 0x141   :  { %v1278_v7 = vsub.s32 32, %v1277_v3  ;;  %v1280_v58 = vshll.u32 %v2336_v23, %v1277_v3  ;;  %v1283_v39 = vshll.u32 %v2337_v27, %v1277_v3  ;;  %v1289_v44 = vshll.u32 %v2339_v31, %v1277_v3 }
 0x142   :  { %v412_v51 = vsel %vm329_vm13, %v411_v34, %v410_v61  ;;  %v1238_v15 = vor.u32 4788187, %v1237_v5  ;;  %v2596_v14 = vshrl.u32 %v492_v6, 30  ;;  %v1241_v30 = vcvt.s32.f32 %v1234_v4 }
 0x143   :  { %v415_v19 = vsel %vm2512_vm14, %v2389_v53, %v412_v51  ;;  %v1281_v13 = vshrl.u32 %v2337_v27, %v1278_v7  ;;  %v1284_v32 = vshrl.u32 %v2338_v29, %v1278_v7  ;;  %v1287_v38 = vshrl.u32 %v2339_v31, %v1278_v7 }
 0x144   :  { %2199 = vcosq.f32 %v415_v19  ;;  %v1239_v28 = vand.u32 2147483647, %v1238_v15  ;;  %v494_v37 = vshll.u32 %v2596_v14, 30  ;;  %v1290_v41 = vshrl.u32 %v2340_v33, %v1278_v7 }
 0x145   :  { %2201 = vsinq.f32 %v415_v19  ;;  %v1282_v43 = vor.u32 %v1281_v13, %v1280_v58  ;;  %v1286_v45 = vshll.u32 %v2338_v29, %v1277_v3  ;;  %v2613_v56 = vadd.f32 %v2383_v46, %v215_v9 }
 0x146   :  { %v1242_v18 = vmul.f32 %v1241_v30, %v1239_v28  ;;  %v2609_v42 = vsub.s32 %v491_v16, %v494_v37  ;;  %v1285_v49 = vor.u32 %v1284_v32, %v1283_v39  ;;  %v1291_v50 = vor.u32 %v1290_v41, %v1289_v44 }
 0x147   :  { %v1293_v22 = vshrl.u32 %v2341_v40, %v1278_v7  ;;  %v2616_v52 = vand.u32 3, %v1252_v21  ;;  %v1288_v59 = vor.u32 %v1287_v38, %v1286_v45  ;;  %v1292_v61 = vshll.u32 %v2340_v33, %v1277_v3 }
 0x148   :  { %v1243_v48 = vxor.u32 2147483648, %v1242_v18  ;;  %v497_v57 = vsub.s32 0, %v2609_v42  ;;  %vm426_vm9 = vcmp.eq.s32.totalorder %v2594_v12, 2  ;;  %vm1295_vm10 = vcmp.lt.s32.totalorder %v2602_v35, 1 }
 0x149   :  { %v2624_v55 = vshll.u32 %v1271_v24, 8  ;;  %v2626_v60 = vmul.f32 30.0, %v297_v26  ;;  %vm423_vm11 = vcmp.eq.s32.totalorder %v2594_v12, 0  ;;  %vm433_vm12 = vcmp.lt.s32.totalorder %v2400_v62, 0 }
 0x14a   :  { %v1244_v63 = vsel %vm1161_vm3, %v1243_v48, %v1242_v18  ;;  %v2030_v0 = vmin.u32 %v497_v57, %v2609_v42  ;;  %v1294_v1 = vor.u32 %v1293_v22, %v1292_v61  ;;  %vm1298_vm13 = vcmp.lt.s32.totalorder %v2602_v35, 4 }
 0x14b   :  { %v1247_v8 = vsel %vm2550_vm5, %v2391_v54, %v1244_v63  ;;  %vm422_vm14 = vcmp.lt.s32.totalorder %v2594_v12, 2  ;;  %v1279_v34 = vshrl.u32 %v2336_v23, %v1278_v7  ;;  %v1303_v2 = vsel %vm1295_vm10, %v1282_v43, %v1285_v49 }
 0x14c   :  { %2203 = vcosq.f32 %v1247_v8  ;;  %v1304_v16 = vsel %vm1298_vm13, %v1291_v50, 920167782  ;;  %vm419_vm15 = vweird.f32 %v2389_v53  ;;  %v499_v11 = vclz %v2030_v0 }
 0x14d   :  { %2205 = vsinq.f32 %v1247_v8  ;;  %vm1297_vm0 = vcmp.lt.s32.totalorder %v2602_v35, 3  ;;  %v1300_v3 = vsel %vm1298_vm13, %v1288_v59, 2102212464  ;;  %v517_v4 = vsub.s32 4, %v2596_v14 }
 0x14e   :  { %vm1296_vm1 = vcmp.lt.s32.totalorder %v2602_v35, 2  ;;  %v1305_v5 = vsel %vm1297_vm0, %v1288_v59, %v1304_v16  ;;  %v1307_v51 = vsel %vm1295_vm10, %v1285_v49, %v1288_v59  ;;  %v2031_v6 = vadd.s32 4294967294, %v499_v11 }
 0x14f   :  { %v1299_v7 = vsel %vm1295_vm10, %v1279_v34, %v1282_v43  ;;  %v1306_v26 = vsel %vm1296_vm1, %v1303_v2, %v1305_v5  ;;  %v1308_v19 = vsel %vm1298_vm13, %v1294_v1, 1326507024  ;;  %v1301_v21 = vsel %vm1297_vm0, %v1285_v49, %v1300_v3 }
 0x150   :  { %v1309_v24 = vsel %vm1297_vm0, %v1291_v50, %v1308_v19  ;;  %v2656_v13 = vmul.u32.u64.low %v2624_v55, %v1306_v26  ;;  %v2657_v28 = vmul.u32.u64.high %v2624_v55, %v1306_v26, %v2656_v13  ;;  %v487_v9 = vadd.s32 %v2564_v36, %v2572_v25 }
 0x151   :  { %v2200_v15 = vpop.eup %2199  ;;  %vm2032_vm2 = vcmp.lt.s32.totalorder %v2031_v6, 0  ;;  %v1310_v37 = vsel %vm1296_vm1, %v1307_v51, %v1309_v24  ;;  %v1302_v45 = vsel %vm1296_vm1, %v1299_v7, %v1301_v21  ;;  %v518_v25 = vsel %vm433_vm12, %v517_v4, %v2596_v14 }
 0x152   :  { %v2202_v30 = vpop.eup %2201  ;;  %v427_v32 = vxor.u32 2147483648, %v2200_v15  ;;  %v502_v38 = vsel %vm2032_vm2, 0, %v2031_v6  ;;  %v2665_v18 = vmul.u32.u64.low %v2624_v55, %v1310_v37  ;;  %v2666_v39 = vmul.u32.u64.high %v2624_v55, %v1310_v37, %v2665_v18 }
 0x153   :  { %v424_v58 = vxor.u32 2147483648, %v2202_v30  ;;  %v503_v41 = vsub.s32 32, %v502_v38  ;;  %v507_v43 = vsub.s32 4294967266, %v502_v38  ;;  %v1321_v48 = vadd.s32 1, %v2657_v28 }
 0x154   :  { %v428_v44 = vsel %vm426_vm9, %v427_v32, %v2202_v30  ;;  %v538_v49 = vand.u32 2139095040, %v2626_v60  ;;  %v504_v22 = vshll.u32 %v2609_v42, %v502_v38  ;;  %v1318_v61 = vmul.u32 %v2624_v55, %v1302_v45 }
 0x155   :  { %v425_v36 = vsel %vm423_vm11, %v2200_v15, %v424_v58  ;;  %v505_v57 = vshrl.u32 %v487_v9, %v503_v41  ;;  %v508_v59 = vadd.s32 127, %v507_v43  ;;  %vm1320_vm3 = vc.u32 %v2666_v39, %v2656_v13 }
 0x156   :  { %v429_v50 = vsel %vm422_vm14, %v425_v36, %v428_v44  ;;  %v539_v14 = vshrl.u32 %v538_v49, 23  ;;  %v1322_v0 = vsel %vm1320_vm3, %v1321_v48, %v2657_v28  ;;  %vm1254_vm4 = vcmp.lt.s32.totalorder %v2616_v52, 2 }
 0x157   :  { %v430_v35 = vsel %vm419_vm15, nan, %v429_v50  ;;  %v506_v63 = vor.u32 %v505_v57, %v504_v22  ;;  %v509_v8 = vshll.u32 %v508_v59, 23  ;;  %vm2691_vm5 = vcmp.le.f32.partialorder %v431_v10, 0.7853982 }
 0x158   :  { %1991 = vst [vmem:[#allocation8] sm:$0xff] %v430_v35  ;;  %v1323_v53 = vadd.s32 %v1322_v0, %v1318_v61  ;;  %v2033_v42 = vadd.s32 4294967169, %v539_v14  ;;  %vm1255_vm6 = vcmp.eq.s32.totalorder %v2616_v52, 0  ;;  %v520_v34 = vsel %vm2691_vm5, 0, %v518_v25 }
 0x159   :  { %v2204_v55 = vpop.eup %2203  ;;  %v510_v1 = vor.u32 4788187, %v509_v8  ;;  %v535_v2 = vand.u32 2147483647, %v2626_v60  ;;  %v2700_v10 = vmul.f32 30.0, %v2613_v56  ;;  %vm1258_vm7 = vcmp.eq.s32.totalorder %v2616_v52, 2  ;;  %v193_v56 = vpop.f32.mrf.mxu0 }
 0x15a   :  { %v2206_v16 = vpop.eup %2205  ;;  %v1259_v11 = vxor.u32 2147483648, %v2204_v55  ;;  %v1324_v3 = vadd.s32 536870912, %v1323_v53  ;;  %v545_v4 = vadd.s32 1, %v2033_v42  ;;  %v513_v6 = vcvt.s32.f32 %v506_v63 }
 0x15b   :  { %v1256_v5 = vxor.u32 2147483648, %v2206_v16  ;;  %v511_v51 = vand.u32 2147483647, %v510_v1  ;;  %v524_v26 = vadd.s32 3, %v520_v34  ;;  %v542_v24 = vand.u32 8388607, %v535_v2 }
 0x15c   :  { %v1260_v7 = vsel %vm1258_vm7, %v1259_v11, %v2206_v16  ;;  %v2703_v19 = vshrl.u32 %v1324_v3, 30  ;;  %vm546_vm8 = vcmp.gt.s32.totalorder %v545_v4, 0  ;;  %vm1251_vm9 = vweird.f32 %v2391_v54 }
 0x15d   :  { %v1257_v15 = vsel %vm1255_vm6, %v2204_v55, %v1256_v5  ;;  %v514_v21 = vmul.f32 %v513_v6, %v511_v51  ;;  %v547_v28 = vsel %vm546_vm8, %v545_v4, 0  ;;  %v1370_v9 = vand.u32 2139095040, %v2700_v10 }
 0x15e   :  { %v1261_v30 = vsel %vm1254_vm4, %v1257_v15, %v1260_v7  ;;  %v1326_v32 = vshll.u32 %v2703_v19, 30  ;;  %v549_v38 = vand.u32 31, %v547_v28  ;;  %v2714_v18 = vand.u32 3, %v524_v26 }
 0x15f   :  { %v1262_v37 = vsel %vm1251_vm9, nan, %v1261_v30  ;;  %v515_v58 = vxor.u32 2147483648, %v514_v21  ;;  %v2719_v41 = vadd.f32 %v2385_v47, %v193_v56  ;;  %v1319_v52 = vadd.s32 %v2656_v13, %v2666_v39 }
 0x160   :  { %1999 = vst [vmem:[#allocation8 + $0x40] sm:$0xff] %v1262_v37  ;;  %v2716_v44 = vsub.s32 %v1323_v53, %v1326_v32  ;;  %v543_v43 = vor.u32 8388608, %v542_v24  ;;  %v550_v45 = vsub.s32 32, %v549_v38  ;;  %v1367_v48 = vand.u32 2147483647, %v2700_v10 }
 0x161   :  { %v516_v54 = vsel %vm433_vm12, %v515_v58, %v514_v21  ;;  %v1371_v49 = vshrl.u32 %v1370_v9, 23  ;;  %v548_v50 = vshrl.u32 %v547_v28, 5  ;;  %v552_v39 = vshll.u32 %v2336_v23, %v549_v38 }
 0x162   :  { %v519_v36 = vsel %vm2691_vm5, %v2400_v62, %v516_v54  ;;  %v1329_v25 = vsub.s32 0, %v2716_v44  ;;  %v553_v22 = vshrl.u32 %v2337_v27, %v550_v45  ;;  %v556_v57 = vshrl.u32 %v2338_v29, %v550_v45 }
 0x163   :  { %2207 = vcosq.f32 %v519_v36  ;;  %v555_v59 = vshll.u32 %v2337_v27, %v549_v38  ;;  %v1349_v35 = vsub.s32 4, %v2703_v19  ;;  %v558_v61 = vshll.u32 %v2338_v29, %v549_v38 }
 0x164   :  { %2209 = vsinq.f32 %v519_v36  ;;  %v2062_v13 = vmin.u32 %v1329_v25, %v2716_v44  ;;  %v559_v14 = vshrl.u32 %v2339_v31, %v550_v45  ;;  %v2738_v63 = vshll.u32 %v543_v43, 8 }
 0x165   :  { %v554_v0 = vor.u32 %v553_v22, %v552_v39  ;;  %v557_v12 = vor.u32 %v556_v57, %v555_v59  ;;  %v561_v53 = vshll.u32 %v2339_v31, %v549_v38  ;;  %v562_v55 = vshrl.u32 %v2340_v33, %v550_v45 }
 0x166   :  { %v1331_v8 = vclz %v2062_v13  ;;  %v560_v42 = vor.u32 %v559_v14, %v558_v61  ;;  %v564_v1 = vshll.u32 %v2340_v33, %v549_v38  ;;  %v565_v34 = vshrl.u32 %v2341_v40, %v550_v45 }
 0x167   :  { %vm567_vm10 = vcmp.lt.s32.totalorder %v548_v50, 1  ;;  %vm568_vm11 = vcmp.lt.s32.totalorder %v548_v50, 2  ;;  %v2065_v11 = vadd.s32 4294967169, %v1371_v49  ;;  %vm1265_vm12 = vcmp.lt.s32.totalorder %v2407_v17, 0 }
 0x168   :  { %v2063_v16 = vadd.s32 4294967294, %v1331_v8  ;;  %v551_v3 = vshrl.u32 %v2336_v23, %v550_v45  ;;  %v563_v4 = vor.u32 %v562_v55, %v561_v53  ;;  %v566_v5 = vor.u32 %v565_v34, %v564_v1 }
 0x169   :  { %vm570_vm13 = vcmp.lt.s32.totalorder %v548_v50, 4  ;;  %vm569_vm15 = vcmp.lt.s32.totalorder %v548_v50, 3  ;;  %v575_v6 = vsel %vm567_vm10, %v554_v0, %v557_v12  ;;  %v579_v15 = vsel %vm567_vm10, %v557_v12, %v560_v42 }
 0x16a   :  { %vm2064_vm14 = vcmp.lt.s32.totalorder %v2063_v16, 0  ;;  %v572_v51 = vsel %vm570_vm13, %v560_v42, 2102212464  ;;  %v576_v26 = vsel %vm570_vm13, %v563_v4, 920167782  ;;  %vm526_vm0 = vcmp.lt.s32.totalorder %v2714_v18, 2 }
 0x16b   :  { %v1334_v7 = vsel %vm2064_vm14, 0, %v2063_v16  ;;  %v580_v21 = vsel %vm570_vm13, %v566_v5, 1326507024  ;;  %vm2751_vm1 = vcmp.le.f32.partialorder %v1263_v20, 0.7853982  ;;  %v571_v30 = vsel %vm567_vm10, %v551_v3, %v554_v0 }
 0x16c   :  { %v1335_v28 = vsub.s32 32, %v1334_v7  ;;  %v1339_v56 = vsub.s32 4294967266, %v1334_v7  ;;  %v577_v32 = vsel %vm569_vm15, %v560_v42, %v576_v26  ;;  %vm523_vm2 = vweird.f32 %v2400_v62 }
 0x16d   :  { %v573_v9 = vsel %vm569_vm15, %v557_v12, %v572_v51  ;;  %v578_v37 = vsel %vm568_vm11, %v575_v6, %v577_v32  ;;  %v581_v58 = vsel %vm569_vm15, %v563_v4, %v580_v21  ;;  %v1377_v38 = vadd.s32 1, %v2065_v11 }
 0x16e   :  { %v1336_v20 = vshll.u32 %v2716_v44, %v1334_v7  ;;  %v1337_v54 = vshrl.u32 %v1319_v52, %v1335_v28  ;;  %v1340_v43 = vadd.s32 127, %v1339_v56  ;;  %v582_v45 = vsel %vm568_vm11, %v579_v15, %v581_v58 }
 0x16f   :  { %v2764_v36 = vmul.u32.u64.low %v2738_v63, %v582_v45  ;;  %v2765_v25 = vmul.u32.u64.high %v2738_v63, %v582_v45, %v2764_v36  ;;  %v2768_v49 = vmul.u32.u64.low %v2738_v63, %v578_v37  ;;  %v2769_v22 = vmul.u32.u64.high %v2738_v63, %v578_v37, %v2768_v49 }
 0x170   :  { %v2208_v57 = vpop.eup %2207  ;;  %v1338_v13 = vor.u32 %v1337_v54, %v1336_v20  ;;  %v1341_v39 = vshll.u32 %v1340_v43, 23  ;;  %v574_v59 = vsel %vm568_vm11, %v571_v30, %v573_v9  ;;  %vm1378_vm3 = vcmp.gt.s32.totalorder %v1377_v38, 0 }
 0x171   :  { %v2210_v44 = vpop.eup %2209  ;;  %vm527_vm4 = vcmp.eq.s32.totalorder %v2714_v18, 0  ;;  %v531_v52 = vxor.u32 2147483648, %v2208_v57  ;;  %v1374_v61 = vand.u32 8388607, %v1367_v48  ;;  %v1379_v14 = vsel %vm1378_vm3, %v1377_v38, 0 }
 0x172   :  { %v528_v8 = vxor.u32 2147483648, %v2210_v44  ;;  %vm530_vm5 = vcmp.eq.s32.totalorder %v2714_v18, 2  ;;  %v1342_v0 = vor.u32 4788187, %v1341_v39  ;;  %v1350_v12 = vsel %vm1265_vm12, %v1349_v35, %v2703_v19 }
 0x173   :  { %v532_v53 = vsel %vm530_vm5, %v531_v52, %v2210_v44  ;;  %v590_v50 = vmul.u32 %v2738_v63, %v574_v59  ;;  %vm592_vm6 = vc.u32 %v2765_v25, %v2768_v49  ;;  %v593_v42 = vadd.s32 1, %v2769_v22 }
 0x174   :  { %v529_v55 = vsel %vm527_vm4, %v2208_v57, %v528_v8  ;;  %v1343_v1 = vand.u32 2147483647, %v1342_v0  ;;  %v1345_v34 = vcvt.s32.f32 %v1338_v13  ;;  %v1381_v16 = vand.u32 31, %v1379_v14 }
 0x175   :  { %v533_v11 = vsel %vm526_vm0, %v529_v55, %v532_v53  ;;  %v1352_v3 = vsel %vm2751_vm1, 0, %v1350_v12  ;;  %v594_v19 = vsel %vm592_vm6, %v593_v42, %v2769_v22  ;;  %v1375_v35 = vor.u32 8388608, %v1374_v61 }
 0x176   :  { %v534_v63 = vsel %vm523_vm2, nan, %v533_v11  ;;  %v1346_v4 = vmul.f32 %v1345_v34, %v1343_v1  ;;  %v595_v5 = vadd.s32 %v594_v19, %v590_v50  ;;  %v1382_v51 = vsub.s32 32, %v1381_v16 }
 0x177   :  { %1992 = vst [vmem:[#allocation8 + $0x8] sm:$0xff] %v534_v63  ;;  %v1380_v6 = vshrl.u32 %v1379_v14, 5  ;;  %v1384_v7 = vshll.u32 %v2336_v23, %v1381_v16  ;;  %v1387_v26 = vshll.u32 %v2337_v27, %v1381_v16  ;;  %v1390_v18 = vshll.u32 %v2338_v29, %v1381_v16  ;;  %v217_v63 = vpop.f32.mrf.mxu1 }
 0x178   :  { %v1347_v15 = vxor.u32 2147483648, %v1346_v4  ;;  %v596_v21 = vadd.s32 536870912, %v595_v5  ;;  %v1385_v28 = vshrl.u32 %v2337_v27, %v1382_v51  ;;  %v1393_v56 = vshll.u32 %v2339_v31, %v1381_v16 }
 0x179   :  { %v1388_v62 = vshrl.u32 %v2338_v29, %v1382_v51  ;;  %v1391_v30 = vshrl.u32 %v2339_v31, %v1382_v51  ;;  %v1394_v32 = vshrl.u32 %v2340_v33, %v1382_v51  ;;  %v1396_v9 = vshll.u32 %v2340_v33, %v1381_v16 }
 0x17a   :  { %v1348_v37 = vsel %vm1265_vm12, %v1347_v15, %v1346_v4  ;;  %v597_v58 = vshrl.u32 %v596_v21, 30  ;;  %v1386_v38 = vor.u32 %v1385_v28, %v1384_v7  ;;  %v1397_v20 = vshrl.u32 %v2341_v40, %v1382_v51 }
 0x17b   :  { %v1351_v54 = vsel %vm2751_vm1, %v2407_v17, %v1348_v37  ;;  %v1389_v43 = vor.u32 %v1388_v62, %v1387_v26  ;;  %v1392_v45 = vor.u32 %v1391_v30, %v1390_v18  ;;  %v1395_v36 = vor.u32 %v1394_v32, %v1393_v56 }
 0x17c   :  { %2211 = vcosq.f32 %v1351_v54  ;;  %v1356_v22 = vadd.s32 3, %v1352_v3  ;;  %v598_v57 = vshll.u32 %v597_v58, 30  ;;  %vm1399_vm7 = vcmp.lt.s32.totalorder %v1380_v6, 1 }
 0x17d   :  { %2213 = vsinq.f32 %v1351_v54  ;;  %v1398_v13 = vor.u32 %v1397_v20, %v1396_v9  ;;  %vm1402_vm8 = vcmp.lt.s32.totalorder %v1380_v6, 4  ;;  %v1407_v39 = vsel %vm1399_vm7, %v1386_v38, %v1389_v43 }
 0x17e   :  { %v2807_v59 = vsub.s32 %v595_v5, %v598_v57  ;;  %vm1401_vm9 = vcmp.lt.s32.totalorder %v1380_v6, 3  ;;  %v1408_v44 = vsel %vm1402_vm8, %v1395_v36, 920167782  ;;  %v1415_v52 = vshll.u32 %v1375_v35, 8 }
 0x17f   :  { %v1383_v24 = vshrl.u32 %v2336_v23, %v1382_v51  ;;  %vm1400_vm10 = vcmp.lt.s32.totalorder %v1380_v6, 2  ;;  %v1409_v61 = vsel %vm1401_vm9, %v1392_v45, %v1408_v44  ;;  %v2812_v14 = vmul.f32 30.0, %v2719_v41 }
 0x180   :  { %v601_v8 = vsub.s32 0, %v2807_v59  ;;  %v1404_v0 = vsel %vm1402_vm8, %v1392_v45, 2102212464  ;;  %v1410_v12 = vsel %vm1400_vm10, %v1407_v39, %v1409_v61  ;;  %v1411_v53 = vsel %vm1399_vm7, %v1389_v43, %v1392_v45 }
 0x181   :  { %v621_v50 = vsub.s32 4, %v597_v58  ;;  %v1412_v42 = vsel %vm1402_vm8, %v1398_v13, 1326507024  ;;  %v2817_v55 = vmul.u32.u64.low %v1415_v52, %v1410_v12  ;;  %v2818_v1 = vmul.u32.u64.high %v1415_v52, %v1410_v12, %v2817_v55 }
 0x182   :  { %v1357_v34 = vand.u32 3, %v1356_v22  ;;  %v2034_v16 = vmin.u32 %v601_v8, %v2807_v59  ;;  %v1413_v11 = vsel %vm1401_vm9, %v1395_v36, %v1412_v42  ;;  %v1403_v41 = vsel %vm1399_vm7, %v1383_v24, %v1386_v38 }
 0x183   :  { %v1405_v3 = vsel %vm1401_vm9, %v1389_v43, %v1404_v0  ;;  %v1414_v19 = vsel %vm1400_vm10, %v1411_v53, %v1413_v11  ;;  %v642_v35 = vand.u32 2139095040, %v2812_v14  ;;  %vm537_vm11 = vcmp.lt.s32.totalorder %v2626_v60, 0 }
 0x184   :  { %v603_v4 = vclz %v2034_v16  ;;  %v622_v5 = vsel %vm537_vm11, %v621_v50, %v597_v58  ;;  %v2830_v51 = vmul.u32.u64.low %v1415_v52, %v1414_v19  ;;  %v2831_v7 = vmul.u32.u64.high %v1415_v52, %v1414_v19, %v2830_v51 }
 0x185   :  { %v1406_v18 = vsel %vm1400_vm10, %v1403_v41, %v1405_v3  ;;  %v643_v15 = vshrl.u32 %v642_v35, 23  ;;  %v306_v21 = vadd.f32 %v2385_v47, %v217_v63  ;;  %vm1359_vm12 = vcmp.eq.s32.totalorder %v1357_v34, 0 }
 0x186   :  { %v2035_v26 = vadd.s32 4294967294, %v603_v4  ;;  %vm1362_vm13 = vcmp.eq.s32.totalorder %v1357_v34, 2  ;;  %vm2837_vm14 = vcmp.le.f32.partialorder %v535_v2, 0.7853982  ;;  %v1425_v56 = vadd.s32 1, %v2818_v1 }
 0x187   :  { %v591_v62 = vadd.s32 %v2768_v49, %v2765_v25  ;;  %v624_v6 = vsel %vm2837_vm14, 0, %v622_v5  ;;  %v2037_v30 = vadd.s32 4294967169, %v643_v15  ;;  %v1422_v37 = vmul.u32 %v1415_v52, %v1406_v18 }
 0x188   :  { %vm2036_vm15 = vcmp.lt.s32.totalorder %v2035_v26, 0  ;;  %vm1424_vm0 = vc.u32 %v2831_v7, %v2817_v55  ;;  %v639_v2 = vand.u32 2147483647, %v2812_v14  ;;  %v2849_v43 = vmul.f32 30.0, %v306_v21 }
 0x189   :  { %v2212_v32 = vpop.eup %2211  ;;  %v606_v9 = vsel %vm2036_vm15, 0, %v2035_v26  ;;  %v1426_v45 = vsel %vm1424_vm0, %v1425_v56, %v2818_v1  ;;  %v649_v36 = vadd.s32 1, %v2037_v30  ;;  %vm1355_vm1 = vweird.f32 %v2407_v17  ;;  %v197_v1 = vpop.f32.mrf.mxu0 }
 0x18a   :  { %v2214_v58 = vpop.eup %2213  ;;  %v1363_v38 = vxor.u32 2147483648, %v2212_v32  ;;  %v607_v20 = vsub.s32 32, %v606_v9  ;;  %v611_v54 = vsub.s32 4294967266, %v606_v9  ;;  %v608_v49 = vshll.u32 %v2807_v59, %v606_v9 }
 0x18b   :  { %v1360_v25 = vxor.u32 2147483648, %v2214_v58  ;;  %v1427_v39 = vadd.s32 %v1426_v45, %v1422_v37  ;;  %vm1358_vm2 = vcmp.lt.s32.totalorder %v1357_v34, 2  ;;  %vm650_vm3 = vcmp.gt.s32.totalorder %v649_v36, 0 }
 0x18c   :  { %v1364_v22 = vsel %vm1362_vm13, %v1363_v38, %v2214_v58  ;;  %v609_v57 = vshrl.u32 %v591_v62, %v607_v20  ;;  %v612_v13 = vadd.s32 127, %v611_v54  ;;  %v628_v59 = vadd.s32 3, %v624_v6 }
 0x18d   :  { %v1361_v44 = vsel %vm1359_vm12, %v2212_v32, %v1360_v25  ;;  %v1428_v8 = vadd.s32 536870912, %v1427_v39  ;;  %v646_v12 = vand.u32 8388607, %v639_v2  ;;  %v651_v53 = vsel %vm650_vm3, %v649_v36, 0 }
 0x18e   :  { %v1365_v52 = vsel %vm1358_vm2, %v1361_v44, %v1364_v22  ;;  %v610_v24 = vor.u32 %v609_v57, %v608_v49  ;;  %v613_v61 = vshll.u32 %v612_v13, 23  ;;  %v1474_v17 = vand.u32 2139095040, %v2849_v43 }
 0x18f   :  { %v1366_v0 = vsel %vm1355_vm1, nan, %v1365_v52  ;;  %v2858_v42 = vshrl.u32 %v1428_v8, 30  ;;  %v653_v34 = vand.u32 31, %v651_v53  ;;  %v2862_v3 = vand.u32 3, %v628_v59 }
 0x190   :  { %2000 = vst [vmem:[#allocation8 + $0x48] sm:$0xff] %v1366_v0  ;;  %v614_v50 = vor.u32 4788187, %v613_v61  ;;  %v617_v11 = vcvt.s32.f32 %v610_v24  ;;  %v647_v19 = vor.u32 8388608, %v646_v12  ;;  %v2865_v63 = vadd.f32 %v2383_v46, %v197_v1 }
 0x191   :  { %v1430_v41 = vshll.u32 %v2858_v42, 30  ;;  %v654_v35 = vsub.s32 32, %v653_v34  ;;  %v1423_v5 = vadd.s32 %v2817_v55, %v2831_v7  ;;  %v1475_v26 = vshrl.u32 %v1474_v17, 23 }
 0x192   :  { %v615_v16 = vand.u32 2147483647, %v614_v50  ;;  %v652_v18 = vshrl.u32 %v651_v53, 5  ;;  %v656_v15 = vshll.u32 %v2336_v23, %v653_v34  ;;  %v659_v30 = vshll.u32 %v2337_v27, %v653_v34 }
 0x193   :  { %v2869_v51 = vsub.s32 %v1427_v39, %v1430_v41  ;;  %v657_v21 = vshrl.u32 %v2337_v27, %v654_v35  ;;  %v660_v56 = vshrl.u32 %v2338_v29, %v654_v35  ;;  %v663_v32 = vshrl.u32 %v2339_v31, %v654_v35 }
 0x194   :  { %v618_v4 = vmul.f32 %v617_v11, %v615_v16  ;;  %v662_v55 = vshll.u32 %v2338_v29, %v653_v34  ;;  %v665_v7 = vshll.u32 %v2339_v31, %v653_v34  ;;  %v666_v37 = vshrl.u32 %v2340_v33, %v654_v35 }
 0x195   :  { %v1433_v6 = vsub.s32 0, %v2869_v51  ;;  %v658_v9 = vor.u32 %v657_v21, %v656_v15  ;;  %v661_v20 = vor.u32 %v660_v56, %v659_v30  ;;  %v668_v54 = vshll.u32 %v2340_v33, %v653_v34 }
 0x196   :  { %v619_v62 = vxor.u32 2147483648, %v618_v4  ;;  %v664_v49 = vor.u32 %v663_v32, %v662_v55  ;;  %v667_v45 = vor.u32 %v666_v37, %v665_v7  ;;  %v669_v36 = vshrl.u32 %v2341_v40, %v654_v35 }
 0x197   :  { %v2066_v38 = vmin.u32 %v1433_v6, %v2869_v51  ;;  %vm1369_vm4 = vcmp.lt.s32.totalorder %v2700_v10, 0  ;;  %v687_v57 = vshll.u32 %v647_v19, 8  ;;  %v2069_v13 = vadd.s32 4294967169, %v1475_v26 }
 0x198   :  { %v620_v58 = vsel %vm537_vm11, %v619_v62, %v618_v4  ;;  %v655_v39 = vshrl.u32 %v2336_v23, %v654_v35  ;;  %v670_v44 = vor.u32 %v669_v36, %v668_v54  ;;  %vm671_vm5 = vcmp.lt.s32.totalorder %v652_v18, 1 }
 0x199   :  { %v623_v25 = vsel %vm2837_vm14, %v2626_v60, %v620_v58  ;;  %v1435_v22 = vclz %v2066_v38  ;;  %vm673_vm6 = vcmp.lt.s32.totalorder %v652_v18, 3  ;;  %vm674_vm7 = vcmp.lt.s32.totalorder %v652_v18, 4 }
 0x19a   :  { %2215 = vcosq.f32 %v623_v25  ;;  %v679_v28 = vsel %vm671_vm5, %v658_v9, %v661_v20  ;;  %v676_v24 = vsel %vm674_vm7, %v664_v49, 2102212464  ;;  %v680_v61 = vsel %vm674_vm7, %v667_v45, 920167782 }
 0x19b   :  { %2217 = vsinq.f32 %v623_v25  ;;  %v2067_v52 = vadd.s32 4294967294, %v1435_v22  ;;  %v683_v8 = vsel %vm671_vm5, %v661_v20, %v664_v49  ;;  %v684_v0 = vsel %vm674_vm7, %v670_v44, 1326507024 }
 0x19c   :  { %vm672_vm9 = vcmp.lt.s32.totalorder %v652_v18, 2  ;;  %v681_v59 = vsel %vm673_vm6, %v664_v49, %v680_v61  ;;  %v685_v12 = vsel %vm673_vm6, %v667_v45, %v684_v0  ;;  %v1453_v50 = vsub.s32 4, %v2858_v42 }
 0x19d   :  { %vm2068_vm8 = vcmp.lt.s32.totalorder %v2067_v52, 0  ;;  %v682_v17 = vsel %vm672_vm9, %v679_v28, %v681_v59  ;;  %v686_v1 = vsel %vm672_vm9, %v683_v8, %v685_v12  ;;  %v675_v11 = vsel %vm671_vm5, %v655_v39, %v658_v9 }
 0x19e   :  { %v1438_v53 = vsel %vm2068_vm8, 0, %v2067_v52  ;;  %v677_v41 = vsel %vm673_vm6, %v661_v20, %v676_v24  ;;  %v2899_v19 = vmul.u32.u64.low %v687_v57, %v686_v1  ;;  %v2900_v35 = vmul.u32.u64.high %v687_v57, %v686_v1, %v2899_v19 }
 0x19f   :  { %v1439_v34 = vsub.s32 32, %v1438_v53  ;;  %v1443_v16 = vsub.s32 4294967266, %v1438_v53  ;;  %v2902_v4 = vmul.u32.u64.low %v687_v57, %v682_v17  ;;  %v2903_v26 = vmul.u32.u64.high %v687_v57, %v682_v17, %v2902_v4 }
 0x1a0   :  { %v1440_v15 = vshll.u32 %v2869_v51, %v1438_v53  ;;  %v1481_v62 = vadd.s32 1, %v2069_v13  ;;  %vm630_vm10 = vcmp.lt.s32.totalorder %v2862_v3, 2  ;;  %vm2910_vm11 = vcmp.le.f32.partialorder %v1367_v48, 0.7853982 }
 0x1a1   :  { %v1441_v21 = vshrl.u32 %v1423_v5, %v1439_v34  ;;  %v1444_v56 = vadd.s32 127, %v1443_v16  ;;  %v1454_v30 = vsel %vm1369_vm4, %v1453_v50, %v2858_v42  ;;  %v678_v32 = vsel %vm672_vm9, %v675_v11, %v677_v41 }
 0x1a2   :  { %vm627_vm12 = vweird.f32 %v2626_v60  ;;  %vm1482_vm13 = vcmp.gt.s32.totalorder %v1481_v62, 0  ;;  %v2920_v9 = vmul.f32 30.0, %v2865_v63  ;;  %vm696_vm14 = vc.u32 %v2900_v35, %v2902_v4 }
 0x1a3   :  { %v1442_v51 = vor.u32 %v1441_v21, %v1440_v15  ;;  %v1445_v5 = vshll.u32 %v1444_v56, 23  ;;  %v697_v48 = vadd.s32 1, %v2903_v26  ;;  %v1471_v55 = vand.u32 2147483647, %v2849_v43 }
 0x1a4   :  { %v1483_v7 = vsel %vm1482_vm13, %v1481_v62, 0  ;;  %v1456_v42 = vsel %vm2910_vm11, 0, %v1454_v30  ;;  %v694_v18 = vmul.u32 %v687_v57, %v678_v32  ;;  %vm631_vm15 = vcmp.eq.s32.totalorder %v2862_v3, 0 }
 0x1a5   :  { %v1446_v37 = vor.u32 4788187, %v1445_v5  ;;  %v1485_v58 = vand.u32 31, %v1483_v7  ;;  %vm634_vm0 = vcmp.eq.s32.totalorder %v2862_v3, 2  ;;  %v1449_v63 = vcvt.s32.f32 %v1442_v51 }
 0x1a6   :  { %v698_v20 = vsel %vm696_vm14, %v697_v48, %v2903_v26  ;;  %v1460_v13 = vadd.s32 3, %v1456_v42  ;;  %v1478_v39 = vand.u32 8388607, %v1471_v55  ;;  %v746_v57 = vand.u32 2139095040, %v2920_v9 }
 0x1a7   :  { %v2216_v38 = vpop.eup %2215  ;;  %v1447_v49 = vand.u32 2147483647, %v1446_v37  ;;  %v699_v45 = vadd.s32 %v698_v20, %v694_v18  ;;  %v1486_v36 = vsub.s32 32, %v1485_v58  ;;  %v2934_v24 = vshrl.u32 %v1483_v7, 5 }
 0x1a8   :  { %v2218_v54 = vpop.eup %2217  ;;  %v635_v25 = vxor.u32 2147483648, %v2216_v38  ;;  %v1488_v8 = vshll.u32 %v2336_v23, %v1485_v58  ;;  %v1491_v34 = vshll.u32 %v2337_v27, %v1485_v58  ;;  %v1494_v16 = vshll.u32 %v2338_v29, %v1485_v58 }
 0x1a9   :  { %v632_v22 = vxor.u32 2147483648, %v2218_v54  ;;  %v1450_v52 = vmul.f32 %v1449_v63, %v1447_v49  ;;  %v700_v28 = vadd.s32 536870912, %v699_v45  ;;  %v1489_v0 = vshrl.u32 %v2337_v27, %v1486_v36 }
 0x1aa   :  { %v636_v44 = vsel %vm634_vm0, %v635_v25, %v2218_v54  ;;  %v1492_v59 = vshrl.u32 %v2338_v29, %v1486_v36  ;;  %v1495_v17 = vshrl.u32 %v2339_v31, %v1486_v36  ;;  %v1497_v11 = vshll.u32 %v2339_v31, %v1485_v58 }
 0x1ab   :  { %v633_v61 = vsel %vm631_vm15, %v2216_v38, %v632_v22  ;;  %v1451_v53 = vxor.u32 2147483648, %v1450_v52  ;;  %v2943_v50 = vshrl.u32 %v700_v28, 30  ;;  %v1490_v19 = vor.u32 %v1489_v0, %v1488_v8 }
 0x1ac   :  { %v637_v12 = vsel %vm630_vm10, %v633_v61, %v636_v44  ;;  %v1498_v26 = vshrl.u32 %v2340_v33, %v1486_v36  ;;  %v1493_v15 = vor.u32 %v1492_v59, %v1491_v34  ;;  %v1500_v21 = vshll.u32 %v2340_v33, %v1485_v58  ;;  %v221_v58 = vpop.f32.mrf.mxu1 }
 0x1ad   :  { %v638_v1 = vsel %vm627_vm12, nan, %v637_v12  ;;  %v1452_v41 = vsel %vm1369_vm4, %v1451_v53, %v1450_v52  ;;  %v702_v3 = vshll.u32 %v2943_v50, 30  ;;  %v1501_v56 = vshrl.u32 %v2341_v40, %v1486_v36 }
 0x1ae   :  { %1993 = vst [vmem:[#allocation8 + $0x10] sm:$0xff] %v638_v1  ;;  %v1455_v60 = vsel %vm2910_vm11, %v2700_v10, %v1452_v41  ;;  %v1496_v30 = vor.u32 %v1495_v17, %v1494_v16  ;;  %v1499_v32 = vor.u32 %v1498_v26, %v1497_v11  ;;  %v2962_v51 = vand.u32 3, %v1460_v13 }
 0x1af   :  { %2219 = vcosq.f32 %v1455_v60  ;;  %v2960_v62 = vsub.s32 %v699_v45, %v702_v3  ;;  %v1479_v5 = vor.u32 8388608, %v1478_v39  ;;  %v1502_v48 = vor.u32 %v1501_v56, %v1500_v21 }
 0x1b0   :  { %2221 = vsinq.f32 %v1455_v60  ;;  %vm1503_vm1 = vcmp.lt.s32.totalorder %v2934_v24, 1  ;;  %vm1506_vm2 = vcmp.lt.s32.totalorder %v2934_v24, 4  ;;  %v747_v6 = vshrl.u32 %v746_v57, 23 }
 0x1b1   :  { %v705_v7 = vsub.s32 0, %v2960_v62  ;;  %v1487_v37 = vshrl.u32 %v2336_v23, %v1486_v36  ;;  %vm1505_vm3 = vcmp.lt.s32.totalorder %v2934_v24, 3  ;;  %v1511_v42 = vsel %vm1503_vm1, %v1490_v19, %v1493_v15 }
 0x1b2   :  { %v1512_v18 = vsel %vm1506_vm2, %v1499_v32, 920167782  ;;  %vm1504_vm4 = vcmp.lt.s32.totalorder %v2934_v24, 2  ;;  %v1508_v63 = vsel %vm1506_vm2, %v1496_v30, 2102212464  ;;  %v1515_v25 = vsel %vm1503_vm1, %v1493_v15, %v1496_v30 }
 0x1b3   :  { %v2038_v38 = vmin.u32 %v705_v7, %v2960_v62  ;;  %v1513_v20 = vsel %vm1505_vm3, %v1496_v30, %v1512_v18  ;;  %v1516_v49 = vsel %vm1506_vm2, %v1502_v48, 1326507024  ;;  %v1519_v45 = vshll.u32 %v1479_v5, 8 }
 0x1b4   :  { %v1514_v54 = vsel %vm1504_vm4, %v1511_v42, %v1513_v20  ;;  %v1507_v22 = vsel %vm1503_vm1, %v1487_v37, %v1490_v19  ;;  %v307_v13 = vadd.f32 %v2383_v46, %v221_v58  ;;  %v1509_v39 = vsel %vm1505_vm3, %v1493_v15, %v1508_v63 }
 0x1b5   :  { %v707_v36 = vclz %v2038_v38  ;;  %v1517_v57 = vsel %vm1505_vm3, %v1499_v32, %v1516_v49  ;;  %v2986_v44 = vmul.u32.u64.low %v1519_v45, %v1514_v54  ;;  %v2987_v52 = vmul.u32.u64.high %v1519_v45, %v1514_v54, %v2986_v44 }
 0x1b6   :  { %vm641_vm5 = vcmp.lt.s32.totalorder %v2812_v14, 0  ;;  %v1518_v61 = vsel %vm1504_vm4, %v1515_v25, %v1517_v57  ;;  %v2041_v8 = vadd.s32 4294967169, %v747_v6  ;;  %vm1463_vm6 = vcmp.eq.s32.totalorder %v2962_v51, 0  ;;  %v199_v6 = vpop.f32.mrf.mxu0 }
 0x1b7   :  { %v2039_v28 = vadd.s32 4294967294, %v707_v36  ;;  %vm1466_vm7 = vcmp.eq.s32.totalorder %v2962_v51, 2  ;;  %v2995_v0 = vmul.u32.u64.low %v1519_v45, %v1518_v61  ;;  %v2996_v59 = vmul.u32.u64.high %v1519_v45, %v1518_v61, %v2995_v0 }
 0x1b8   :  { %vm1459_vm8 = vweird.f32 %v2700_v10  ;;  %vm3001_vm9 = vcmp.le.f32.partialorder %v639_v2, 0.7853982  ;;  %v1510_v53 = vsel %vm1504_vm4, %v1507_v22, %v1509_v39  ;;  %v743_v17 = vand.u32 2147483647, %v2920_v9 }
 0x1b9   :  { %vm2040_vm10 = vcmp.lt.s32.totalorder %v2039_v28, 0  ;;  %v753_v1 = vadd.s32 1, %v2041_v8  ;;  %v695_v34 = vadd.s32 %v2902_v4, %v2900_v35  ;;  %v1529_v11 = vadd.s32 1, %v2987_v52 }
 0x1ba   :  { %v710_v16 = vsel %vm2040_vm10, 0, %v2039_v28  ;;  %v3011_v41 = vmul.f32 30.0, %v307_v13  ;;  %v725_v19 = vsub.s32 4, %v2943_v50  ;;  %v1526_v60 = vmul.u32 %v1519_v45, %v1510_v53 }
 0x1bb   :  { %v711_v3 = vsub.s32 32, %v710_v16  ;;  %v715_v2 = vsub.s32 4294967266, %v710_v16  ;;  %vm754_vm11 = vcmp.gt.s32.totalorder %v753_v1, 0  ;;  %v712_v24 = vshll.u32 %v2960_v62, %v710_v16 }
 0x1bc   :  { %v2220_v26 = vpop.eup %2219  ;;  %vm1528_vm12 = vc.u32 %v2996_v59, %v2986_v44  ;;  %v755_v15 = vsel %vm754_vm11, %v753_v1, 0  ;;  %v1578_v7 = vand.u32 2139095040, %v3011_v41  ;;  %v726_v18 = vsel %vm641_vm5, %v725_v19, %v2943_v50 }
 0x1bd   :  { %v2222_v21 = vpop.eup %2221  ;;  %v1467_v35 = vxor.u32 2147483648, %v2220_v26  ;;  %v713_v4 = vshrl.u32 %v695_v34, %v711_v3  ;;  %v716_v56 = vadd.s32 127, %v715_v2  ;;  %v1530_v30 = vsel %vm1528_vm12, %v1529_v11, %v2987_v52  ;;  %v223_v52 = vpop.f32.mrf.mxu1 }
 0x1be   :  { %v1464_v32 = vxor.u32 2147483648, %v2222_v21  ;;  %v1531_v5 = vadd.s32 %v1530_v30, %v1526_v60  ;;  %v757_v48 = vand.u32 31, %v755_v15  ;;  %vm1462_vm13 = vcmp.lt.s32.totalorder %v2962_v51, 2 }
 0x1bf   :  { %v1468_v62 = vsel %vm1466_vm7, %v1467_v35, %v2222_v21  ;;  %v714_v37 = vor.u32 %v713_v4, %v712_v24  ;;  %v717_v42 = vshll.u32 %v716_v56, 23  ;;  %v750_v25 = vand.u32 8388607, %v743_v17 }
 0x1c0   :  { %v1465_v58 = vsel %vm1463_vm6, %v2220_v26, %v1464_v32  ;;  %v1532_v38 = vadd.s32 536870912, %v1531_v5  ;;  %v758_v63 = vsub.s32 32, %v757_v48  ;;  %v3030_v49 = vadd.f32 %v2385_v47, %v199_v6 }
 0x1c1   :  { %v1469_v20 = vsel %vm1462_vm13, %v1465_v58, %v1468_v62  ;;  %v718_v54 = vor.u32 4788187, %v717_v42  ;;  %v728_v50 = vsel %vm3001_vm9, 0, %v726_v18  ;;  %v1579_v51 = vshrl.u32 %v1578_v7, 23 }
 0x1c2   :  { %v1470_v45 = vsel %vm1459_vm8, nan, %v1469_v20  ;;  %v3036_v36 = vshrl.u32 %v1532_v38, 30  ;;  %v721_v13 = vcvt.s32.f32 %v714_v37  ;;  %v761_v39 = vshrl.u32 %v2337_v27, %v758_v63 }
 0x1c3   :  { %2001 = vst [vmem:[#allocation8 + $0x50] sm:$0xff] %v1470_v45  ;;  %v719_v22 = vand.u32 2147483647, %v718_v54  ;;  %v764_v57 = vshrl.u32 %v2338_v29, %v758_v63  ;;  %v756_v61 = vshrl.u32 %v755_v15, 5  ;;  %v760_v10 = vshll.u32 %v2336_v23, %v757_v48 }
 0x1c4   :  { %v1534_v28 = vshll.u32 %v3036_v36, 30  ;;  %v767_v8 = vshrl.u32 %v2339_v31, %v758_v63  ;;  %v763_v53 = vshll.u32 %v2337_v27, %v757_v48  ;;  %v769_v1 = vshll.u32 %v2339_v31, %v757_v48 }
 0x1c5   :  { %v722_v0 = vmul.f32 %v721_v13, %v719_v22  ;;  %v770_v34 = vshrl.u32 %v2340_v33, %v758_v63  ;;  %v766_v11 = vshll.u32 %v2338_v29, %v757_v48  ;;  %v773_v3 = vshrl.u32 %v2341_v40, %v758_v63 }
 0x1c6   :  { %v3046_v16 = vsub.s32 %v1531_v5, %v1534_v28  ;;  %v3051_v2 = vadd.f32 %v2385_v47, %v223_v52  ;;  %v762_v26 = vor.u32 %v761_v39, %v760_v10  ;;  %v765_v24 = vor.u32 %v764_v57, %v763_v53 }
 0x1c7   :  { %v723_v19 = vxor.u32 2147483648, %v722_v0  ;;  %v771_v60 = vor.u32 %v770_v34, %v769_v1  ;;  %v732_v15 = vadd.s32 3, %v728_v50  ;;  %v768_v35 = vor.u32 %v767_v8, %v766_v11 }
 0x1c8   :  { %v1537_v21 = vsub.s32 0, %v3046_v16  ;;  %v772_v4 = vshll.u32 %v2340_v33, %v757_v48  ;;  %v751_v30 = vor.u32 8388608, %v750_v25  ;;  %vm775_vm14 = vcmp.lt.s32.totalorder %v756_v61, 1 }
 0x1c9   :  { %v724_v56 = vsel %vm641_vm5, %v723_v19, %v722_v0  ;;  %v2073_v32 = vadd.s32 4294967169, %v1579_v51  ;;  %vm778_vm15 = vcmp.lt.s32.totalorder %v756_v61, 4  ;;  %v759_v62 = vshrl.u32 %v2336_v23, %v758_v63 }
 0x1ca   :  { %v727_v5 = vsel %vm3001_vm9, %v2812_v14, %v724_v56  ;;  %v2070_v7 = vmin.u32 %v1537_v21, %v3046_v16  ;;  %v774_v6 = vor.u32 %v773_v3, %v772_v4  ;;  %v783_v37 = vsel %vm775_vm14, %v762_v26, %v765_v24 }
 0x1cb   :  { %2223 = vcosq.f32 %v727_v5  ;;  %v784_v48 = vsel %vm778_vm15, %v771_v60, 920167782  ;;  %vm1473_vm0 = vcmp.lt.s32.totalorder %v2849_v43, 0  ;;  %vm777_vm1 = vcmp.lt.s32.totalorder %v756_v61, 3 }
 0x1cc   :  { %2225 = vsinq.f32 %v727_v5  ;;  %v1539_v42 = vclz %v2070_v7  ;;  %v780_v18 = vsel %vm778_vm15, %v768_v35, 2102212464  ;;  %vm776_vm2 = vcmp.lt.s32.totalorder %v756_v61, 2 }
 0x1cd   :  { %v785_v12 = vsel %vm777_vm1, %v768_v35, %v784_v48  ;;  %v787_v58 = vsel %vm775_vm14, %v765_v24, %v768_v35  ;;  %v791_v38 = vshll.u32 %v751_v30, 8  ;;  %v779_v54 = vsel %vm775_vm14, %v759_v62, %v762_v26 }
 0x1ce   :  { %v2071_v20 = vadd.s32 4294967294, %v1539_v42  ;;  %v786_v63 = vsel %vm776_vm2, %v783_v37, %v785_v12  ;;  %v788_v25 = vsel %vm778_vm15, %v774_v6, 1326507024  ;;  %v781_v45 = vsel %vm777_vm1, %v765_v24, %v780_v18 }
 0x1cf   :  { %v789_v50 = vsel %vm777_vm1, %v771_v60, %v788_v25  ;;  %v3070_v51 = vmul.u32.u64.low %v791_v38, %v786_v63  ;;  %v3071_v22 = vmul.u32.u64.high %v791_v38, %v786_v63, %v3070_v51  ;;  %v1527_v13 = vadd.s32 %v2986_v44, %v2996_v59 }
 0x1d0   :  { %vm2072_vm3 = vcmp.lt.s32.totalorder %v2071_v20, 0  ;;  %v790_v39 = vsel %vm776_vm2, %v787_v58, %v789_v50  ;;  %v1585_v57 = vadd.s32 1, %v2073_v32  ;;  %v1557_v28 = vsub.s32 4, %v3036_v36 }
 0x1d1   :  { %v1542_v52 = vsel %vm2072_vm3, 0, %v2071_v20  ;;  %v3078_v10 = vmul.u32.u64.low %v791_v38, %v790_v39  ;;  %v3079_v8 = vmul.u32.u64.high %v791_v38, %v790_v39, %v3078_v10  ;;  %v782_v1 = vsel %vm776_vm2, %v779_v54, %v781_v45 }
 0x1d2   :  { %v1543_v0 = vsub.s32 32, %v1542_v52  ;;  %v1547_v53 = vsub.s32 4294967266, %v1542_v52  ;;  %vm1586_vm4 = vcmp.gt.s32.totalorder %v1585_v57, 0  ;;  %v733_v34 = vand.u32 3, %v732_v15 }
 0x1d3   :  { %v801_v11 = vadd.s32 1, %v3071_v22  ;;  %v1575_v44 = vand.u32 2147483647, %v3011_v41  ;;  %v1587_v59 = vsel %vm1586_vm4, %v1585_v57, 0  ;;  %v1544_v3 = vshll.u32 %v3046_v16, %v1542_v52 }
 0x1d4   :  { %v1545_v19 = vshrl.u32 %v1527_v13, %v1543_v0  ;;  %v1548_v26 = vadd.s32 127, %v1547_v53  ;;  %v1589_v24 = vand.u32 31, %v1587_v59  ;;  %vm731_vm5 = vweird.f32 %v2812_v14 }
 0x1d5   :  { %vm3088_vm6 = vcmp.le.f32.partialorder %v1471_v55, 0.7853982  ;;  %v1558_v61 = vsel %vm1473_vm0, %v1557_v28, %v3036_v36  ;;  %v798_v15 = vmul.u32 %v791_v38, %v782_v1  ;;  %vm800_vm7 = vc.u32 %v3079_v8, %v3070_v51 }
 0x1d6   :  { %v1546_v16 = vor.u32 %v1545_v19, %v1544_v3  ;;  %v1549_v21 = vshll.u32 %v1548_v26, 23  ;;  %v802_v35 = vsel %vm800_vm7, %v801_v11, %v3071_v22  ;;  %v1590_v4 = vsub.s32 32, %v1589_v24 }
 0x1d7   :  { %vm734_vm8 = vcmp.lt.s32.totalorder %v733_v34, 2  ;;  %vm735_vm9 = vcmp.eq.s32.totalorder %v733_v34, 0  ;;  %vm738_vm10 = vcmp.eq.s32.totalorder %v733_v34, 2  ;;  %v803_v55 = vadd.s32 %v802_v35, %v798_v15 }
 0x1d8   :  { %v2224_v56 = vpop.eup %2223  ;;  %v1550_v30 = vor.u32 4788187, %v1549_v21  ;;  %v1560_v32 = vsel %vm3088_vm6, 0, %v1558_v61  ;;  %v1582_v36 = vand.u32 8388607, %v1575_v44  ;;  %v3102_v5 = vshrl.u32 %v1587_v59, 5 }
 0x1d9   :  { %v2226_v7 = vpop.eup %2225  ;;  %v739_v6 = vxor.u32 2147483648, %v2224_v56  ;;  %v804_v62 = vadd.s32 536870912, %v803_v55  ;;  %v1592_v37 = vshll.u32 %v2336_v23, %v1589_v24  ;;  %v1595_v48 = vshll.u32 %v2337_v27, %v1589_v24 }
 0x1da   :  { %v736_v42 = vxor.u32 2147483648, %v2226_v7  ;;  %v1551_v18 = vand.u32 2147483647, %v1550_v30  ;;  %v1553_v12 = vcvt.s32.f32 %v1546_v16  ;;  %v1593_v58 = vshrl.u32 %v2337_v27, %v1590_v4 }
 0x1db   :  { %v740_v38 = vsel %vm738_vm10, %v739_v6, %v2226_v7  ;;  %v805_v20 = vshrl.u32 %v804_v62, 30  ;;  %v1596_v54 = vshrl.u32 %v2338_v29, %v1590_v4  ;;  %v1599_v63 = vshrl.u32 %v2339_v31, %v1590_v4 }
 0x1dc   :  { %v737_v25 = vsel %vm735_vm9, %v2224_v56, %v736_v42  ;;  %v1554_v45 = vmul.f32 %v1553_v12, %v1551_v18  ;;  %v1601_v50 = vshll.u32 %v2339_v31, %v1589_v24  ;;  %v1602_v22 = vshrl.u32 %v2340_v33, %v1590_v4 }
 0x1dd   :  { %v741_v13 = vsel %vm734_vm8, %v737_v25, %v740_v38  ;;  %v806_v39 = vshll.u32 %v805_v20, 30  ;;  %v1598_v57 = vshll.u32 %v2338_v29, %v1589_v24  ;;  %v1605_v52 = vshrl.u32 %v2341_v40, %v1590_v4 }
 0x1de   :  { %v742_v28 = vsel %vm731_vm5, nan, %v741_v13  ;;  %v1555_v10 = vxor.u32 2147483648, %v1554_v45  ;;  %v1603_v0 = vor.u32 %v1602_v22, %v1601_v50  ;;  %v1604_v53 = vshll.u32 %v2340_v33, %v1589_v24 }
 0x1df   :  { %1994 = vst [vmem:[#allocation8 + $0x18] sm:$0xff] %v742_v28  ;;  %v3119_v1 = vsub.s32 %v803_v55, %v806_v39  ;;  %v1594_v11 = vor.u32 %v1593_v58, %v1592_v37  ;;  %v1597_v59 = vor.u32 %v1596_v54, %v1595_v48  ;;  %v1600_v3 = vor.u32 %v1599_v63, %v1598_v57 }
 0x1e0   :  { %v1556_v34 = vsel %vm1473_vm0, %v1555_v10, %v1554_v45  ;;  %v1564_v19 = vadd.s32 3, %v1560_v32  ;;  %vm745_vm11 = vcmp.lt.s32.totalorder %v2920_v9, 0  ;;  %v1583_v26 = vor.u32 8388608, %v1582_v36 }
 0x1e1   :  { %v1606_v61 = vor.u32 %v1605_v52, %v1604_v53  ;;  %v1559_v14 = vsel %vm3088_vm6, %v2849_v43, %v1556_v34  ;;  %v809_v24 = vsub.s32 0, %v3119_v1  ;;  %vm1610_vm12 = vcmp.lt.s32.totalorder %v3102_v5, 4 }
 0x1e2   :  { %v3130_v15 = vmul.f32 30.0, %v3030_v49  ;;  %2227 = vcosq.f32 %v1559_v14  ;;  %vm1607_vm13 = vcmp.lt.s32.totalorder %v3102_v5, 1  ;;  %vm1609_vm14 = vcmp.lt.s32.totalorder %v3102_v5, 3 }
 0x1e3   :  { %v1616_v16 = vsel %vm1610_vm12, %v1603_v0, 920167782  ;;  %2229 = vsinq.f32 %v1559_v14  ;;  %v2042_v21 = vmin.u32 %v809_v24, %v3119_v1  ;;  %v1612_v35 = vsel %vm1610_vm12, %v1600_v3, 2102212464 }
 0x1e4   :  { %v1615_v55 = vsel %vm1607_vm13, %v1594_v11, %v1597_v59  ;;  %v1591_v60 = vshrl.u32 %v2336_v23, %v1590_v4  ;;  %v1617_v56 = vsel %vm1609_vm14, %v1600_v3, %v1616_v16  ;;  %v1619_v30 = vsel %vm1607_vm13, %v1597_v59, %v1600_v3 }
 0x1e5   :  { %v1620_v32 = vsel %vm1610_vm12, %v1606_v61, 1326507024  ;;  %v811_v49 = vclz %v2042_v21  ;;  %v829_v36 = vsub.s32 4, %v805_v20  ;;  %vm1608_vm15 = vcmp.lt.s32.totalorder %v3102_v5, 2 }
 0x1e6   :  { %v1623_v7 = vshll.u32 %v1583_v26, 8  ;;  %v1611_v6 = vsel %vm1607_vm13, %v1591_v60, %v1594_v11  ;;  %v1613_v62 = vsel %vm1609_vm14, %v1597_v59, %v1612_v35  ;;  %v1618_v37 = vsel %vm1608_vm15, %v1615_v55, %v1617_v56 }
 0x1e7   :  { %v1621_v48 = vsel %vm1609_vm14, %v1603_v0, %v1620_v32  ;;  %v2043_v42 = vadd.s32 4294967294, %v811_v49  ;;  %vm3148_vm0 = vcmp.le.f32.partialorder %v743_v17, 0.7853982  ;;  %v850_v63 = vand.u32 2139095040, %v3130_v15 }
 0x1e8   :  { %v1622_v4 = vsel %vm1608_vm15, %v1619_v30, %v1621_v48  ;;  %v3143_v18 = vmul.u32.u64.low %v1623_v7, %v1618_v37  ;;  %v3144_v12 = vmul.u32.u64.high %v1623_v7, %v1618_v37, %v3143_v18  ;;  %v1565_v25 = vand.u32 3, %v1564_v19 }
 0x1e9   :  { %v3152_v38 = vmul.u32.u64.low %v1623_v7, %v1622_v4  ;;  %v3153_v54 = vmul.u32.u64.high %v1623_v7, %v1622_v4, %v3152_v38  ;;  %vm2044_vm1 = vcmp.lt.s32.totalorder %v2043_v42, 0  ;;  %v830_v5 = vsel %vm745_vm11, %v829_v36, %v805_v20 }
 0x1ea   :  { %v1614_v45 = vsel %vm1608_vm15, %v1611_v6, %v1613_v62  ;;  %v799_v50 = vadd.s32 %v3070_v51, %v3079_v8  ;;  %v814_v22 = vsel %vm2044_vm1, 0, %v2043_v42  ;;  %v851_v13 = vshrl.u32 %v850_v63, 23 }
 0x1eb   :  { %v3161_v17 = vmul.f32 30.0, %v3051_v2  ;;  %v815_v39 = vsub.s32 32, %v814_v22  ;;  %v819_v57 = vsub.s32 4294967266, %v814_v22  ;;  %v1633_v52 = vadd.s32 1, %v3144_v12 }
 0x1ec   :  { %v847_v28 = vand.u32 2147483647, %v3130_v15  ;;  %vm1563_vm2 = vweird.f32 %v2849_v43  ;;  %v832_v20 = vsel %vm3148_vm0, 0, %v830_v5  ;;  %v1630_v10 = vmul.u32 %v1623_v7, %v1614_v45 }
 0x1ed   :  { %vm1632_vm3 = vc.u32 %v3153_v54, %v3143_v18  ;;  %v2045_v51 = vadd.s32 4294967169, %v851_v13  ;;  %v816_v8 = vshll.u32 %v3119_v1, %v814_v22  ;;  %v817_v0 = vshrl.u32 %v799_v50, %v815_v39 }
 0x1ee   :  { %v820_v2 = vadd.s32 127, %v819_v57  ;;  %v1634_v53 = vsel %vm1632_vm3, %v1633_v52, %v3144_v12  ;;  %vm1566_vm4 = vcmp.lt.s32.totalorder %v1565_v25, 2  ;;  %v1682_v3 = vand.u32 2139095040, %v3161_v17 }
 0x1ef   :  { %v1635_v11 = vadd.s32 %v1634_v53, %v1630_v10  ;;  %v857_v59 = vadd.s32 1, %v2045_v51  ;;  %v2228_v34 = vpop.eup %2227  ;;  %vm1567_vm5 = vcmp.eq.s32.totalorder %v1565_v25, 0  ;;  %v818_v19 = vor.u32 %v817_v0, %v816_v8 }
 0x1f0   :  { %v821_v26 = vshll.u32 %v820_v2, 23  ;;  %v836_v61 = vadd.s32 3, %v832_v20  ;;  %v2230_v14 = vpop.eup %2229  ;;  %vm1570_vm6 = vcmp.eq.s32.totalorder %v1565_v25, 2  ;;  %v1571_v24 = vxor.u32 2147483648, %v2228_v34 }
 0x1f1   :  { %v1636_v16 = vadd.s32 536870912, %v1635_v11  ;;  %vm858_vm7 = vcmp.gt.s32.totalorder %v857_v59, 0  ;;  %v1568_v1 = vxor.u32 2147483648, %v2230_v14  ;;  %v854_v35 = vand.u32 8388607, %v847_v28 }
 0x1f2   :  { %v822_v21 = vor.u32 4788187, %v821_v26  ;;  %v859_v55 = vsel %vm858_vm7, %v857_v59, 0  ;;  %v1572_v60 = vsel %vm1570_vm6, %v1571_v24, %v2230_v14  ;;  %v1683_v32 = vshrl.u32 %v1682_v3, 23 }
 0x1f3   :  { %v1637_v56 = vshrl.u32 %v1636_v16, 30  ;;  %v861_v30 = vand.u32 31, %v859_v55  ;;  %v1569_v49 = vsel %vm1567_vm5, %v2228_v34, %v1568_v1  ;;  %v825_v7 = vcvt.s32.f32 %v818_v19 }
 0x1f4   :  { %v823_v36 = vand.u32 2147483647, %v822_v21  ;;  %v3175_v6 = vand.u32 3, %v836_v61  ;;  %v1573_v62 = vsel %vm1566_vm4, %v1569_v49, %v1572_v60  ;;  %vm1577_vm8 = vcmp.lt.s32.totalorder %v3011_v41, 0 }
 0x1f5   :  { %v1638_v37 = vshll.u32 %v1637_v56, 30  ;;  %v862_v48 = vsub.s32 32, %v861_v30  ;;  %v1679_v42 = vand.u32 2147483647, %v3161_v17  ;;  %v1574_v4 = vsel %vm1563_vm2, nan, %v1573_v62 }
 0x1f6   :  { %v826_v12 = vmul.f32 %v825_v7, %v823_v36  ;;  %v1631_v38 = vadd.s32 %v3143_v18, %v3153_v54  ;;  %v855_v63 = vor.u32 8388608, %v854_v35  ;;  %2002 = vst [vmem:[#allocation8 + $0x58] sm:$0xff] %v1574_v4  ;;  %v3185_v45 = vshrl.u32 %v859_v55, 5 }
 0x1f7   :  { %v3183_v5 = vsub.s32 %v1635_v11, %v1638_v37  ;;  %v865_v25 = vshrl.u32 %v2337_v27, %v862_v48  ;;  %v2077_v50 = vadd.s32 4294967169, %v1683_v32  ;;  %v1661_v13 = vsub.s32 4, %v1637_v56 }
 0x1f8   :  { %v827_v22 = vxor.u32 2147483648, %v826_v12  ;;  %v864_v39 = vshll.u32 %v2336_v23, %v861_v30  ;;  %v868_v57 = vshrl.u32 %v2338_v29, %v862_v48  ;;  %v867_v52 = vshll.u32 %v2337_v27, %v861_v30 }
 0x1f9   :  { %v1641_v43 = vsub.s32 0, %v3183_v5  ;;  %v870_v18 = vshll.u32 %v2338_v29, %v861_v30  ;;  %v871_v54 = vshrl.u32 %v2339_v31, %v862_v48  ;;  %v873_v51 = vshll.u32 %v2339_v31, %v861_v30 }
 0x1fa   :  { %v828_v20 = vsel %vm745_vm11, %v827_v22, %v826_v12  ;;  %v866_v10 = vor.u32 %v865_v25, %v864_v39  ;;  %v874_v8 = vshrl.u32 %v2340_v33, %v862_v48  ;;  %v869_v53 = vor.u32 %v868_v57, %v867_v52  ;;  %v203_v57 = vpop.f32.mrf.mxu0 }
 0x1fb   :  { %v831_v0 = vsel %vm3148_vm0, %v2920_v9, %v828_v20  ;;  %v2074_v2 = vmin.u32 %v1641_v43, %v3183_v5  ;;  %v872_v11 = vor.u32 %v871_v54, %v870_v18  ;;  %v876_v3 = vshll.u32 %v2340_v33, %v861_v30 }
 0x1fc   :  { %2231 = vcosq.f32 %v831_v0  ;;  %v875_v59 = vor.u32 %v874_v8, %v873_v51  ;;  %v877_v34 = vshrl.u32 %v2341_v40, %v862_v48  ;;  %v3204_v26 = vshll.u32 %v855_v63, 8 }
 0x1fd   :  { %2233 = vsinq.f32 %v831_v0  ;;  %v1643_v19 = vclz %v2074_v2  ;;  %v3208_v61 = vand.u32 8388607, %v1679_v42  ;;  %vm3212_vm9 = vcmp.le.f32.partialorder %v1575_v44, 0.7853982 }
 0x1fe   :  { %v1662_v14 = vsel %vm1577_vm8, %v1661_v13, %v1637_v56  ;;  %v863_v24 = vshrl.u32 %v2336_v23, %v862_v48  ;;  %v878_v16 = vor.u32 %v877_v34, %v876_v3  ;;  %v1689_v1 = vadd.s32 1, %v2077_v50 }
 0x1ff   :  { %v2075_v21 = vadd.s32 4294967294, %v1643_v19  ;;  %vm879_vm10 = vcmp.lt.s32.totalorder %v3185_v45, 1  ;;  %vm881_vm11 = vcmp.lt.s32.totalorder %v3185_v45, 3  ;;  %vm882_vm12 = vcmp.lt.s32.totalorder %v3185_v45, 4 }
 0x200   :  { %v884_v35 = vsel %vm882_vm12, %v872_v11, 2102212464  ;;  %v887_v55 = vsel %vm879_vm10, %v866_v10, %v869_v53  ;;  %v888_v44 = vsel %vm882_vm12, %v875_v59, 920167782  ;;  %v891_v60 = vsel %vm879_vm10, %v869_v53, %v872_v11 }
 0x201   :  { %vm2076_vm13 = vcmp.lt.s32.totalorder %v2075_v21, 0  ;;  %vm880_vm14 = vcmp.lt.s32.totalorder %v3185_v45, 2  ;;  %v889_v56 = vsel %vm881_vm11, %v872_v11, %v888_v44  ;;  %v892_v30 = vsel %vm882_vm12, %v878_v16, 1326507024 }
 0x202   :  { %v1646_v32 = vsel %vm2076_vm13, 0, %v2075_v21  ;;  %v883_v49 = vsel %vm879_vm10, %v863_v24, %v866_v10  ;;  %v890_v36 = vsel %vm880_vm14, %v887_v55, %v889_v56  ;;  %v893_v7 = vsel %vm881_vm11, %v875_v59, %v892_v30 }
 0x203   :  { %v1647_v62 = vsub.s32 32, %v1646_v32  ;;  %v1651_v37 = vsub.s32 4294967266, %v1646_v32  ;;  %v885_v48 = vsel %vm881_vm11, %v869_v53, %v884_v35  ;;  %v894_v4 = vsel %vm880_vm14, %v891_v60, %v893_v7 }
 0x204   :  { %v3234_v12 = vmul.u32.u64.low %v3204_v26, %v894_v4  ;;  %v3235_v63 = vmul.u32.u64.high %v3204_v26, %v894_v4, %v3234_v12  ;;  %v3238_v25 = vmul.u32.u64.low %v3204_v26, %v890_v36  ;;  %v3239_v50 = vmul.u32.u64.high %v3204_v26, %v890_v36, %v3238_v25 }
 0x205   :  { %v1648_v22 = vshll.u32 %v3183_v5, %v1646_v32  ;;  %v1649_v13 = vshrl.u32 %v1631_v38, %v1647_v62  ;;  %v1652_v39 = vadd.s32 127, %v1651_v37  ;;  %vm1690_vm15 = vcmp.gt.s32.totalorder %v1689_v1, 0 }
 0x206   :  { %vm835_vm0 = vweird.f32 %v2920_v9  ;;  %vm838_vm1 = vcmp.lt.s32.totalorder %v3175_v6, 2  ;;  %vm839_vm2 = vcmp.eq.s32.totalorder %v3175_v6, 0  ;;  %v886_v43 = vsel %vm880_vm14, %v883_v49, %v885_v48 }
 0x207   :  { %v1691_v52 = vsel %vm1690_vm15, %v1689_v1, 0  ;;  %v1650_v18 = vor.u32 %v1649_v13, %v1648_v22  ;;  %v1653_v54 = vshll.u32 %v1652_v39, 23  ;;  %v1664_v20 = vsel %vm3212_vm9, 0, %v1662_v14 }
 0x208   :  { %v1693_v5 = vand.u32 31, %v1691_v52  ;;  %vm842_vm3 = vcmp.eq.s32.totalorder %v3175_v6, 2  ;;  %vm904_vm4 = vc.u32 %v3235_v63, %v3238_v25  ;;  %v905_v38 = vadd.s32 1, %v3239_v50 }
 0x209   :  { %v301_v10 = vadd.f32 %v2383_v46, %v203_v57  ;;  %v2232_v51 = vpop.eup %2231  ;;  %v1654_v8 = vor.u32 4788187, %v1653_v54  ;;  %v902_v45 = vmul.u32 %v3204_v26, %v886_v43  ;;  %v1687_v0 = vor.u32 8388608, %v3208_v61 }
 0x20a   :  { %v1694_v2 = vsub.s32 32, %v1693_v5  ;;  %v2234_v53 = vpop.eup %2233  ;;  %v843_v11 = vxor.u32 2147483648, %v2232_v51  ;;  %v1668_v59 = vadd.s32 3, %v1664_v20  ;;  %v906_v3 = vsel %vm904_vm4, %v905_v38, %v3239_v50 }
 0x20b   :  { %v3258_v34 = vshrl.u32 %v1691_v52, 5  ;;  %v840_v19 = vxor.u32 2147483648, %v2234_v53  ;;  %v1655_v14 = vand.u32 2147483647, %v1654_v8  ;;  %v1657_v24 = vcvt.s32.f32 %v1650_v18 }
 0x20c   :  { %v907_v16 = vadd.s32 %v906_v3, %v902_v45  ;;  %v844_v1 = vsel %vm842_vm3, %v843_v11, %v2234_v53  ;;  %v1696_v21 = vshll.u32 %v2336_v23, %v1693_v5  ;;  %v1697_v26 = vshrl.u32 %v2337_v27, %v1694_v2 }
 0x20d   :  { %v1700_v61 = vshrl.u32 %v2338_v29, %v1694_v2  ;;  %v841_v35 = vsel %vm839_vm2, %v2232_v51, %v840_v19  ;;  %v1658_v55 = vmul.f32 %v1657_v24, %v1655_v14  ;;  %v1703_v60 = vshrl.u32 %v2339_v31, %v1694_v2 }
 0x20e   :  { %v908_v44 = vadd.s32 536870912, %v907_v16  ;;  %v845_v56 = vsel %vm838_vm1, %v841_v35, %v844_v1  ;;  %v1699_v30 = vshll.u32 %v2337_v27, %v1693_v5  ;;  %v1702_v32 = vshll.u32 %v2338_v29, %v1693_v5 }
 0x20f   :  { %v1705_v49 = vshll.u32 %v2339_v31, %v1693_v5  ;;  %v846_v36 = vsel %vm835_vm0, nan, %v845_v56  ;;  %v1659_v7 = vxor.u32 2147483648, %v1658_v55  ;;  %v1706_v37 = vshrl.u32 %v2340_v33, %v1694_v2 }
 0x210   :  { %v909_v62 = vshrl.u32 %v908_v44, 30  ;;  %1995 = vst [vmem:[#allocation8 + $0x20] sm:$0xff] %v846_v36  ;;  %v1698_v48 = vor.u32 %v1697_v26, %v1696_v21  ;;  %v1701_v4 = vor.u32 %v1700_v61, %v1699_v30  ;;  %v1708_v12 = vshll.u32 %v2340_v33, %v1693_v5 }
 0x211   :  { %v1709_v6 = vshrl.u32 %v2341_v40, %v1694_v2  ;;  %v1660_v50 = vsel %vm1577_vm8, %v1659_v7, %v1658_v55  ;;  %v1704_v13 = vor.u32 %v1703_v60, %v1702_v32  ;;  %v1707_v39 = vor.u32 %v1706_v37, %v1705_v49 }
 0x212   :  { %v910_v22 = vshll.u32 %v909_v62, 30  ;;  %v1663_v9 = vsel %vm3212_vm9, %v3011_v41, %v1660_v50  ;;  %v3283_v57 = vand.u32 3, %v1668_v59  ;;  %v1727_v52 = vshll.u32 %v1687_v0, 8  ;;  %v227_v59 = vpop.f32.mrf.mxu1 }
 0x213   :  { %v1710_v43 = vor.u32 %v1709_v6, %v1708_v12  ;;  %2235 = vcosq.f32 %v1663_v9  ;;  %vm1711_vm5 = vcmp.lt.s32.totalorder %v3258_v34, 1  ;;  %v3288_v54 = vmul.f32 30.0, %v301_v10 }
 0x214   :  { %v3285_v18 = vsub.s32 %v907_v16, %v910_v22  ;;  %2237 = vsinq.f32 %v1663_v9  ;;  %v1695_v20 = vshrl.u32 %v2336_v23, %v1694_v2  ;;  %vm1714_vm6 = vcmp.lt.s32.totalorder %v3258_v34, 4 }
 0x215   :  { %v1719_v5 = vsel %vm1711_vm5, %v1698_v48, %v1701_v4  ;;  %vm1713_vm7 = vcmp.lt.s32.totalorder %v3258_v34, 3  ;;  %v1716_v38 = vsel %vm1714_vm6, %v1704_v13, 2102212464  ;;  %v1720_v51 = vsel %vm1714_vm6, %v1707_v39, 920167782 }
 0x216   :  { %v913_v58 = vsub.s32 0, %v3285_v18  ;;  %vm1712_vm8 = vcmp.lt.s32.totalorder %v3258_v34, 2  ;;  %v1721_v8 = vsel %vm1713_vm7, %v1704_v13, %v1720_v51  ;;  %v1723_v45 = vsel %vm1711_vm5, %v1701_v4, %v1704_v13 }
 0x217   :  { %v1724_v0 = vsel %vm1714_vm6, %v1710_v43, 1326507024  ;;  %v1715_v53 = vsel %vm1711_vm5, %v1695_v20, %v1698_v48  ;;  %v1722_v2 = vsel %vm1712_vm8, %v1719_v5, %v1721_v8  ;;  %v1717_v3 = vsel %vm1713_vm7, %v1701_v4, %v1716_v38 }
 0x218   :  { %v2046_v10 = vmin.u32 %v913_v58, %v3285_v18  ;;  %v1725_v11 = vsel %vm1713_vm7, %v1707_v39, %v1724_v0  ;;  %v3300_v14 = vmul.u32.u64.low %v1727_v52, %v1722_v2  ;;  %v3301_v24 = vmul.u32.u64.high %v1727_v52, %v1722_v2, %v3300_v14 }
 0x219   :  { %v1726_v19 = vsel %vm1712_vm8, %v1723_v45, %v1725_v11  ;;  %v933_v1 = vsub.s32 4, %v909_v62  ;;  %vm849_vm9 = vcmp.lt.s32.totalorder %v3130_v15, 0  ;;  %v309_v61 = vadd.f32 %v2383_v46, %v227_v59 }
 0x21a   :  { %v915_v16 = vclz %v2046_v10  ;;  %v3305_v21 = vmul.u32.u64.low %v1727_v52, %v1726_v19  ;;  %v3306_v26 = vmul.u32.u64.high %v1727_v52, %v1726_v19, %v3305_v21  ;;  %vm3311_vm10 = vcmp.le.f32.partialorder %v847_v28, 0.7853982 }
 0x21b   :  { %v1718_v44 = vsel %vm1712_vm8, %v1715_v53, %v1717_v3  ;;  %v954_v60 = vand.u32 2139095040, %v3288_v54  ;;  %vm1670_vm11 = vcmp.lt.s32.totalorder %v3283_v57, 2  ;;  %vm1671_vm12 = vcmp.eq.s32.totalorder %v3283_v57, 0 }
 0x21c   :  { %v2047_v55 = vadd.s32 4294967294, %v915_v16  ;;  %v1737_v56 = vadd.s32 1, %v3301_v24  ;;  %v951_v46 = vand.u32 2147483647, %v3288_v54  ;;  %vm1667_vm13 = vweird.f32 %v3011_v41 }
 0x21d   :  { %vm1674_vm14 = vcmp.eq.s32.totalorder %v3283_v57, 2  ;;  %v934_v28 = vsel %vm849_vm9, %v933_v1, %v909_v62  ;;  %v955_v34 = vshrl.u32 %v954_v60, 23  ;;  %v1734_v32 = vmul.u32 %v1727_v52, %v1718_v44 }
 0x21e   :  { %vm2048_vm15 = vcmp.lt.s32.totalorder %v2047_v55, 0  ;;  %vm1736_vm0 = vc.u32 %v3306_v26, %v3300_v14  ;;  %v3328_v49 = vmul.f32 30.0, %v309_v61  ;;  %v903_v36 = vadd.s32 %v3238_v25, %v3235_v63 }
 0x21f   :  { %v918_v30 = vsel %vm2048_vm15, 0, %v2047_v55  ;;  %v1738_v48 = vsel %vm1736_vm0, %v1737_v56, %v3301_v24  ;;  %v936_v12 = vsel %vm3311_vm10, 0, %v934_v28  ;;  %v2049_v6 = vadd.s32 4294967169, %v955_v34 }
 0x220   :  { %v919_v7 = vsub.s32 32, %v918_v30  ;;  %v923_v37 = vsub.s32 4294967266, %v918_v30  ;;  %v2236_v4 = vpop.eup %2235  ;;  %v1739_v62 = vadd.s32 %v1738_v48, %v1734_v32  ;;  %v958_v50 = vand.u32 8388607, %v951_v46 }
 0x221   :  { %v2238_v22 = vpop.eup %2237  ;;  %v1675_v13 = vxor.u32 2147483648, %v2236_v4  ;;  %v920_v39 = vshll.u32 %v3285_v18, %v918_v30  ;;  %v961_v52 = vadd.s32 1, %v2049_v6  ;;  %v1786_v20 = vand.u32 2139095040, %v3328_v49 }
 0x222   :  { %v921_v9 = vshrl.u32 %v903_v36, %v919_v7  ;;  %v924_v43 = vadd.s32 127, %v923_v37  ;;  %v1672_v63 = vxor.u32 2147483648, %v2238_v22  ;;  %v1740_v25 = vadd.s32 536870912, %v1739_v62 }
 0x223   :  { %v1676_v5 = vsel %vm1674_vm14, %v1675_v13, %v2238_v22  ;;  %v940_v51 = vadd.s32 3, %v936_v12  ;;  %v959_v0 = vor.u32 8388608, %v958_v50  ;;  %vm962_vm1 = vcmp.gt.s32.totalorder %v961_v52, 0 }
 0x224   :  { %v922_v58 = vor.u32 %v921_v9, %v920_v39  ;;  %v925_v38 = vshll.u32 %v924_v43, 23  ;;  %v1673_v8 = vsel %vm1671_vm12, %v2236_v4, %v1672_v63  ;;  %v1741_v45 = vshrl.u32 %v1740_v25, 30 }
 0x225   :  { %v1677_v18 = vsel %vm1670_vm11, %v1673_v8, %v1676_v5  ;;  %v963_v53 = vsel %vm962_vm1, %v961_v52, 0  ;;  %v1783_v2 = vand.u32 2147483647, %v3328_v49  ;;  %v1787_v3 = vshrl.u32 %v1786_v20, 23 }
 0x226   :  { %v926_v10 = vor.u32 4788187, %v925_v38  ;;  %v1678_v11 = vsel %vm1667_vm13, nan, %v1677_v18  ;;  %v1742_v59 = vshll.u32 %v1741_v45, 30  ;;  %v929_v24 = vcvt.s32.f32 %v922_v58 }
 0x227   :  { %2003 = vst [vmem:[#allocation8 + $0x60] sm:$0xff] %v1678_v11  ;;  %vm1681_vm2 = vcmp.lt.s32.totalorder %v3161_v17, 0  ;;  %v965_v16 = vand.u32 31, %v963_v53  ;;  %v3349_v1 = vand.u32 3, %v940_v51  ;;  %v1735_v57 = vadd.s32 %v3300_v14, %v3306_v26 }
 0x228   :  { %v927_v19 = vand.u32 2147483647, %v926_v10  ;;  %v3353_v21 = vsub.s32 %v1739_v62, %v1742_v59  ;;  %v3355_v61 = vshll.u32 %v959_v0, 8  ;;  %v1765_v41 = vsub.s32 4, %v1741_v45 }
 0x229   :  { %v966_v44 = vsub.s32 32, %v965_v16  ;;  %v3359_v60 = vand.u32 8388607, %v1783_v2  ;;  %v964_v28 = vshrl.u32 %v963_v53, 5  ;;  %v968_v34 = vshll.u32 %v2336_v23, %v965_v16 }
 0x22a   :  { %v930_v55 = vmul.f32 %v929_v24, %v927_v19  ;;  %v1745_v56 = vsub.s32 0, %v3353_v21  ;;  %v2081_v30 = vadd.s32 4294967169, %v1787_v3  ;;  %vm3365_vm3 = vcmp.le.f32.partialorder %v1679_v42, 0.7853982 }
 0x22b   :  { %v969_v26 = vshrl.u32 %v2337_v27, %v966_v44  ;;  %v971_v36 = vshll.u32 %v2337_v27, %v965_v16  ;;  %v972_v7 = vshrl.u32 %v2338_v29, %v966_v44  ;;  %v974_v48 = vshll.u32 %v2338_v29, %v965_v16 }
 0x22c   :  { %v931_v32 = vxor.u32 2147483648, %v930_v55  ;;  %v2078_v37 = vmin.u32 %v1745_v56, %v3353_v21  ;;  %v975_v4 = vshrl.u32 %v2339_v31, %v966_v44  ;;  %v977_v12 = vshll.u32 %v2339_v31, %v965_v16  ;;  %v205_v56 = vpop.f32.mrf.mxu0 }
 0x22d   :  { %v970_v62 = vor.u32 %v969_v26, %v968_v34  ;;  %v973_v6 = vor.u32 %v972_v7, %v971_v36  ;;  %v978_v50 = vshrl.u32 %v2340_v33, %v966_v44  ;;  %v1766_v39 = vsel %vm1681_vm2, %v1765_v41, %v1741_v45 }
 0x22e   :  { %v932_v42 = vsel %vm849_vm9, %v931_v32, %v930_v55  ;;  %v1747_v13 = vclz %v2078_v37  ;;  %vm983_vm4 = vcmp.lt.s32.totalorder %v964_v28, 1  ;;  %v976_v9 = vor.u32 %v975_v4, %v974_v48 }
 0x22f   :  { %v935_v22 = vsel %vm3311_vm10, %v3130_v15, %v932_v42  ;;  %v979_v43 = vor.u32 %v978_v50, %v977_v12  ;;  %vm984_vm5 = vcmp.lt.s32.totalorder %v964_v28, 2  ;;  %v980_v25 = vshll.u32 %v2340_v33, %v965_v16 }
 0x230   :  { %2239 = vcosq.f32 %v935_v22  ;;  %v2079_v63 = vadd.s32 4294967294, %v1747_v13  ;;  %v981_v52 = vshrl.u32 %v2341_v40, %v966_v44  ;;  %v967_v20 = vshrl.u32 %v2336_v23, %v966_v44 }
 0x231   :  { %2241 = vsinq.f32 %v935_v22  ;;  %vm985_vm6 = vcmp.lt.s32.totalorder %v964_v28, 3  ;;  %vm986_vm7 = vcmp.lt.s32.totalorder %v964_v28, 4  ;;  %v991_v35 = vsel %vm983_vm4, %v970_v62, %v973_v6 }
 0x232   :  { %vm2080_vm8 = vcmp.lt.s32.totalorder %v2079_v63, 0  ;;  %v982_v5 = vor.u32 %v981_v52, %v980_v25  ;;  %v988_v58 = vsel %vm986_vm7, %v976_v9, 2102212464  ;;  %v992_v38 = vsel %vm986_vm7, %v979_v43, 920167782 }
 0x233   :  { %v1750_v51 = vsel %vm2080_vm8, 0, %v2079_v63  ;;  %v987_v8 = vsel %vm983_vm4, %v967_v20, %v970_v62  ;;  %v989_v45 = vsel %vm985_vm6, %v973_v6, %v988_v58  ;;  %v993_v0 = vsel %vm985_vm6, %v976_v9, %v992_v38 }
 0x234   :  { %v1751_v18 = vsub.s32 32, %v1750_v51  ;;  %v1755_v10 = vsub.s32 4294967266, %v1750_v51  ;;  %v1768_v53 = vsel %vm3365_vm3, 0, %v1766_v39  ;;  %v995_v11 = vsel %vm983_vm4, %v973_v6, %v976_v9 }
 0x235   :  { %v1752_v59 = vshll.u32 %v3353_v21, %v1750_v51  ;;  %v994_v3 = vsel %vm984_vm5, %v991_v35, %v993_v0  ;;  %v996_v19 = vsel %vm986_vm7, %v982_v5, 1326507024  ;;  %v1793_v24 = vadd.s32 1, %v2081_v30 }
 0x236   :  { %v1753_v16 = vshrl.u32 %v1735_v57, %v1751_v18  ;;  %v1756_v55 = vadd.s32 127, %v1755_v10  ;;  %v990_v41 = vsel %vm984_vm5, %v987_v8, %v989_v45  ;;  %v997_v44 = vsel %vm985_vm6, %v979_v43, %v996_v19 }
 0x237   :  { %v998_v34 = vsel %vm984_vm5, %v995_v11, %v997_v44  ;;  %v3403_v32 = vmul.u32.u64.low %v3355_v61, %v994_v3  ;;  %v3404_v26 = vmul.u32.u64.high %v3355_v61, %v994_v3, %v3403_v32  ;;  %vm1794_vm9 = vcmp.gt.s32.totalorder %v1793_v24, 0 }
 0x238   :  { %v1754_v21 = vor.u32 %v1753_v16, %v1752_v59  ;;  %v1757_v36 = vshll.u32 %v1756_v55, 23  ;;  %v3408_v7 = vmul.u32.u64.low %v3355_v61, %v998_v34  ;;  %v3409_v30 = vmul.u32.u64.high %v3355_v61, %v998_v34, %v3408_v7 }
 0x239   :  { %vm939_vm10 = vweird.f32 %v3130_v15  ;;  %vm942_vm11 = vcmp.lt.s32.totalorder %v3349_v1, 2  ;;  %v1795_v57 = vsel %vm1794_vm9, %v1793_v24, 0  ;;  %v302_v28 = vadd.f32 %v2385_v47, %v205_v56 }
 0x23a   :  { %vm943_vm12 = vcmp.eq.s32.totalorder %v3349_v1, 0  ;;  %vm946_vm13 = vcmp.eq.s32.totalorder %v3349_v1, 2  ;;  %v1758_v37 = vor.u32 4788187, %v1757_v36  ;;  %v1797_v48 = vand.u32 31, %v1795_v57 }
 0x23b   :  { %v1772_v4 = vadd.s32 3, %v1768_v53  ;;  %v1006_v12 = vmul.u32 %v3355_v61, %v990_v41  ;;  %v1009_v42 = vadd.s32 1, %v3404_v26  ;;  %v1791_v62 = vor.u32 8388608, %v3359_v60 }
 0x23c   :  { %v1759_v50 = vand.u32 2147483647, %v1758_v37  ;;  %v1761_v22 = vcvt.s32.f32 %v1754_v21  ;;  %vm1008_vm14 = vc.u32 %v3409_v30, %v3403_v32  ;;  %v1798_v13 = vsub.s32 32, %v1797_v48 }
 0x23d   :  { %v2240_v6 = vpop.eup %2239  ;;  %v1010_v43 = vsel %vm1008_vm14, %v1009_v42, %v3404_v26  ;;  %v3422_v63 = vshrl.u32 %v1795_v57, 5  ;;  %v3424_v25 = vmul.f32 30.0, %v302_v28  ;;  %v1800_v60 = vshll.u32 %v2336_v23, %v1797_v48 }
 0x23e   :  { %v2242_v39 = vpop.eup %2241  ;;  %v947_v9 = vxor.u32 2147483648, %v2240_v6  ;;  %v1762_v52 = vmul.f32 %v1761_v22, %v1759_v50  ;;  %v1011_v20 = vadd.s32 %v1010_v43, %v1006_v12  ;;  %v1801_v5 = vshrl.u32 %v2337_v27, %v1798_v13  ;;  %v229_v43 = vpop.f32.mrf.mxu1 }
 0x23f   :  { %v944_v61 = vxor.u32 2147483648, %v2242_v39  ;;  %v1803_v58 = vshll.u32 %v2337_v27, %v1797_v48  ;;  %v1804_v38 = vshrl.u32 %v2338_v29, %v1798_v13  ;;  %v1806_v0 = vshll.u32 %v2338_v29, %v1797_v48 }
 0x240   :  { %v948_v35 = vsel %vm946_vm13, %v947_v9, %v2242_v39  ;;  %v1763_v8 = vxor.u32 2147483648, %v1762_v52  ;;  %v1012_v45 = vadd.s32 536870912, %v1011_v20  ;;  %v1802_v10 = vor.u32 %v1801_v5, %v1800_v60 }
 0x241   :  { %v945_v51 = vsel %vm943_vm12, %v2240_v6, %v944_v61  ;;  %v1805_v53 = vor.u32 %v1804_v38, %v1803_v58  ;;  %v1807_v11 = vshrl.u32 %v2339_v31, %v1798_v13  ;;  %v1809_v24 = vshll.u32 %v2339_v31, %v1797_v48 }
 0x242   :  { %v949_v18 = vsel %vm942_vm11, %v945_v51, %v948_v35  ;;  %v1764_v3 = vsel %vm1681_vm2, %v1763_v8, %v1762_v52  ;;  %v1013_v19 = vshrl.u32 %v1012_v45, 30  ;;  %v1810_v1 = vshrl.u32 %v2340_v33, %v1798_v13 }
 0x243   :  { %v950_v59 = vsel %vm939_vm10, nan, %v949_v18  ;;  %v1767_v16 = vsel %vm3365_vm3, %v3161_v17, %v1764_v3  ;;  %v1812_v55 = vshll.u32 %v2340_v33, %v1797_v48  ;;  %v1813_v41 = vshrl.u32 %v2341_v40, %v1798_v13 }
 0x244   :  { %1996 = vst [vmem:[#allocation8 + $0x28] sm:$0xff] %v950_v59  ;;  %2243 = vcosq.f32 %v1767_v16  ;;  %v1014_v15 = vshll.u32 %v1013_v19, 30  ;;  %v1808_v44 = vor.u32 %v1807_v11, %v1806_v0  ;;  %v1811_v56 = vor.u32 %v1810_v1, %v1809_v24 }
 0x245   :  { %2245 = vsinq.f32 %v1767_v16  ;;  %v1814_v34 = vor.u32 %v1813_v41, %v1812_v55  ;;  %v3449_v26 = vand.u32 3, %v1772_v4  ;;  %vm1815_vm15 = vcmp.lt.s32.totalorder %v3422_v63, 1 }
 0x246   :  { %v3451_v21 = vsub.s32 %v1011_v20, %v1014_v15  ;;  %v1831_v14 = vshll.u32 %v1791_v62, 8  ;;  %v1799_v36 = vshrl.u32 %v2336_v23, %v1798_v13  ;;  %vm1818_vm0 = vcmp.lt.s32.totalorder %v3422_v63, 4 }
 0x247   :  { %v1823_v7 = vsel %vm1815_vm15, %v1802_v10, %v1805_v53  ;;  %v1058_v57 = vand.u32 2139095040, %v3424_v25  ;;  %vm1816_vm1 = vcmp.lt.s32.totalorder %v3422_v63, 2  ;;  %vm1817_vm2 = vcmp.lt.s32.totalorder %v3422_v63, 3 }
 0x248   :  { %v1017_v28 = vsub.s32 0, %v3451_v21  ;;  %v1824_v37 = vsel %vm1818_vm0, %v1811_v56, 920167782  ;;  %v1820_v48 = vsel %vm1818_vm0, %v1808_v44, 2102212464  ;;  %v1827_v12 = vsel %vm1815_vm15, %v1805_v53, %v1808_v44 }
 0x249   :  { %v1825_v4 = vsel %vm1817_vm2, %v1808_v44, %v1824_v37  ;;  %v1828_v42 = vsel %vm1818_vm0, %v1814_v34, 1326507024  ;;  %v1037_v6 = vsub.s32 4, %v1013_v19  ;;  %vm3479_vm3 = vcmp.le.f32.partialorder %v951_v46, 0.7853982 }
 0x24a   :  { %v2050_v62 = vmin.u32 %v1017_v28, %v3451_v21  ;;  %v1826_v50 = vsel %vm1816_vm1, %v1823_v7, %v1825_v4  ;;  %v1829_v22 = vsel %vm1817_vm2, %v1811_v56, %v1828_v42  ;;  %v1819_v20 = vsel %vm1815_vm15, %v1799_v36, %v1802_v10 }
 0x24b   :  { %v1830_v13 = vsel %vm1816_vm1, %v1827_v12, %v1829_v22  ;;  %v3473_v39 = vmul.u32.u64.low %v1831_v14, %v1826_v50  ;;  %v3474_v9 = vmul.u32.u64.high %v1831_v14, %v1826_v50, %v3473_v39  ;;  %v1821_v60 = vsel %vm1817_vm2, %v1805_v53, %v1820_v48 }
 0x24c   :  { %v1019_v52 = vclz %v2050_v62  ;;  %vm953_vm4 = vcmp.lt.s32.totalorder %v3288_v54, 0  ;;  %v3488_v35 = vmul.u32.u64.low %v1831_v14, %v1830_v13  ;;  %v3489_v5 = vmul.u32.u64.high %v1831_v14, %v1830_v13, %v3488_v35 }
 0x24d   :  { %v1059_v58 = vshrl.u32 %v1058_v57, 23  ;;  %vm1771_vm5 = vweird.f32 %v3161_v17  ;;  %vm1774_vm6 = vcmp.lt.s32.totalorder %v3449_v26, 2  ;;  %v1038_v38 = vsel %vm953_vm4, %v1037_v6, %v1013_v19 }
 0x24e   :  { %v2051_v46 = vadd.s32 4294967294, %v1019_v52  ;;  %v310_v51 = vadd.f32 %v2385_v47, %v229_v43  ;;  %vm1775_vm7 = vcmp.eq.s32.totalorder %v3449_v26, 0  ;;  %v1822_v8 = vsel %vm1816_vm1, %v1819_v20, %v1821_v60 }
 0x24f   :  { %v1841_v45 = vadd.s32 1, %v3474_v9  ;;  %v2053_v0 = vadd.s32 4294967169, %v1059_v58  ;;  %vm1778_vm8 = vcmp.eq.s32.totalorder %v3449_v26, 2  ;;  %v1007_v18 = vadd.s32 %v3403_v32, %v3409_v30 }
 0x250   :  { %vm2052_vm9 = vcmp.lt.s32.totalorder %v2051_v46, 0  ;;  %v1055_v10 = vand.u32 2147483647, %v3424_v25  ;;  %v1040_v47 = vsel %vm3479_vm3, 0, %v1038_v38  ;;  %vm1840_vm10 = vc.u32 %v3489_v5, %v3473_v39 }
 0x251   :  { %v2244_v53 = vpop.eup %2243  ;;  %v1022_v11 = vsel %vm2052_vm9, 0, %v2051_v46  ;;  %v1065_v63 = vadd.s32 1, %v2053_v0  ;;  %v1838_v16 = vmul.u32 %v1831_v14, %v1822_v8  ;;  %v1842_v30 = vsel %vm1840_vm10, %v1841_v45, %v3474_v9 }
 0x252   :  { %v2246_v59 = vpop.eup %2245  ;;  %v1779_v3 = vxor.u32 2147483648, %v2244_v53  ;;  %v1023_v19 = vsub.s32 32, %v1022_v11  ;;  %v1027_v24 = vsub.s32 4294967266, %v1022_v11  ;;  %v1024_v32 = vshll.u32 %v3451_v21, %v1022_v11 }
 0x253   :  { %v1776_v1 = vxor.u32 2147483648, %v2246_v59  ;;  %vm1066_vm11 = vcmp.gt.s32.totalorder %v1065_v63, 0  ;;  %v1843_v44 = vadd.s32 %v1842_v30, %v1838_v16  ;;  %v1044_v34 = vadd.s32 3, %v1040_v47 }
 0x254   :  { %v1780_v55 = vsel %vm1778_vm8, %v1779_v3, %v2246_v59  ;;  %v1025_v41 = vshrl.u32 %v1007_v18, %v1023_v19  ;;  %v1028_v15 = vadd.s32 127, %v1027_v24  ;;  %v1067_v36 = vsel %vm1066_vm11, %v1065_v63, 0 }
 0x255   :  { %v1777_v56 = vsel %vm1775_vm7, %v2244_v53, %v1776_v1  ;;  %v3514_v7 = vmul.f32 30.0, %v310_v51  ;;  %v1844_v28 = vadd.s32 536870912, %v1843_v44  ;;  %v1062_v48 = vand.u32 8388607, %v1055_v10 }
 0x256   :  { %v1781_v14 = vsel %vm1774_vm6, %v1777_v56, %v1780_v55  ;;  %v1026_v21 = vor.u32 %v1025_v41, %v1024_v32  ;;  %v1029_v57 = vshll.u32 %v1028_v15, 23  ;;  %v1069_v4 = vand.u32 31, %v1067_v36 }
 0x257   :  { %v1782_v37 = vsel %vm1771_vm5, nan, %v1781_v14  ;;  %v3522_v42 = vshrl.u32 %v1844_v28, 30  ;;  %v3524_v62 = vand.u32 3, %v1044_v34  ;;  %v1890_v26 = vand.u32 2139095040, %v3514_v7 }
 0x258   :  { %2004 = vst [vmem:[#allocation8 + $0x68] sm:$0xff] %v1782_v37  ;;  %v1030_v12 = vor.u32 4788187, %v1029_v57  ;;  %v1070_v6 = vsub.s32 32, %v1069_v4  ;;  %v1033_v22 = vcvt.s32.f32 %v1026_v21  ;;  %v1887_v17 = vand.u32 2147483647, %v3514_v7 }
 0x259   :  { %v1846_v13 = vshll.u32 %v3522_v42, 30  ;;  %v1063_v9 = vor.u32 8388608, %v1062_v48  ;;  %v1072_v58 = vshll.u32 %v2336_v23, %v1069_v4  ;;  %v1068_v38 = vshrl.u32 %v1067_v36, 5 }
 0x25a   :  { %v1031_v50 = vand.u32 2147483647, %v1030_v12  ;;  %v1073_v43 = vshrl.u32 %v2337_v27, %v1070_v6  ;;  %v1076_v52 = vshrl.u32 %v2338_v29, %v1070_v6  ;;  %v1079_v20 = vshrl.u32 %v2339_v31, %v1070_v6 }
 0x25b   :  { %v3532_v35 = vsub.s32 %v1843_v44, %v1846_v13  ;;  %v1082_v46 = vshrl.u32 %v2340_v33, %v1070_v6  ;;  %v1075_v51 = vshll.u32 %v2337_v27, %v1069_v4  ;;  %v1078_v8 = vshll.u32 %v2338_v29, %v1069_v4 }
 0x25c   :  { %v1034_v60 = vmul.f32 %v1033_v22, %v1031_v50  ;;  %v1891_v45 = vshrl.u32 %v1890_v26, 23  ;;  %v1074_v53 = vor.u32 %v1073_v43, %v1072_v58  ;;  %v1081_v11 = vshll.u32 %v2339_v31, %v1069_v4 }
 0x25d   :  { %v1849_v18 = vsub.s32 0, %v3532_v35  ;;  %v1077_v47 = vor.u32 %v1076_v52, %v1075_v51  ;;  %v1080_v63 = vor.u32 %v1079_v20, %v1078_v8  ;;  %v1084_v59 = vshll.u32 %v2340_v33, %v1069_v4 }
 0x25e   :  { %v1035_v0 = vxor.u32 2147483648, %v1034_v60  ;;  %v1085_v3 = vshrl.u32 %v2341_v40, %v1070_v6  ;;  %v1083_v16 = vor.u32 %v1082_v46, %v1081_v11  ;;  %v1103_v1 = vshll.u32 %v1063_v9, 8 }
 0x25f   :  { %v2082_v24 = vmin.u32 %v1849_v18, %v3532_v35  ;;  %v1071_v30 = vshrl.u32 %v2336_v23, %v1070_v6  ;;  %v2085_v41 = vadd.s32 4294967169, %v1891_v45  ;;  %vm1087_vm12 = vcmp.lt.s32.totalorder %v1068_v38, 1 }
 0x260   :  { %v1036_v19 = vsel %vm953_vm4, %v1035_v0, %v1034_v60  ;;  %v1086_v55 = vor.u32 %v1085_v3, %v1084_v59  ;;  %vm1090_vm13 = vcmp.lt.s32.totalorder %v1068_v38, 4  ;;  %vm1088_vm14 = vcmp.lt.s32.totalorder %v1068_v38, 2 }
 0x261   :  { %v1039_v32 = vsel %vm3479_vm3, %v3288_v54, %v1036_v19  ;;  %v1851_v15 = vclz %v2082_v24  ;;  %v1092_v44 = vsel %vm1090_vm13, %v1080_v63, 2102212464  ;;  %v1095_v56 = vsel %vm1087_vm12, %v1074_v53, %v1077_v47 }
 0x262   :  { %2247 = vcosq.f32 %v1039_v32  ;;  %vm1089_vm15 = vcmp.lt.s32.totalorder %v1068_v38, 3  ;;  %v1096_v36 = vsel %vm1090_vm13, %v1083_v16, 920167782  ;;  %v1099_v14 = vsel %vm1087_vm12, %v1077_v47, %v1080_v63 }
 0x263   :  { %2249 = vsinq.f32 %v1039_v32  ;;  %v2083_v34 = vadd.s32 4294967294, %v1851_v15  ;;  %v1091_v21 = vsel %vm1087_vm12, %v1071_v30, %v1074_v53  ;;  %v1097_v57 = vsel %vm1089_vm15, %v1080_v63, %v1096_v36 }
 0x264   :  { %v1100_v61 = vsel %vm1090_vm13, %v1086_v55, 1326507024  ;;  %v1897_v28 = vadd.s32 1, %v2085_v41  ;;  %v1093_v37 = vsel %vm1089_vm15, %v1077_v47, %v1092_v44  ;;  %v1098_v48 = vsel %vm1088_vm14, %v1095_v56, %v1097_v57 }
 0x265   :  { %vm2084_vm0 = vcmp.lt.s32.totalorder %v2083_v34, 0  ;;  %v1101_v4 = vsel %vm1089_vm15, %v1083_v16, %v1100_v61  ;;  %v3551_v26 = vmul.u32.u64.low %v1103_v1, %v1098_v48  ;;  %v3552_v50 = vmul.u32.u64.high %v1103_v1, %v1098_v48, %v3551_v26 }
 0x266   :  { %v1854_v12 = vsel %vm2084_vm0, 0, %v2083_v34  ;;  %v1102_v6 = vsel %vm1088_vm14, %v1099_v14, %v1101_v4  ;;  %v1839_v22 = vadd.s32 %v3473_v39, %v3489_v5  ;;  %vm1898_vm1 = vcmp.gt.s32.totalorder %v1897_v28, 0 }
 0x267   :  { %v1855_v13 = vsub.s32 32, %v1854_v12  ;;  %v1859_v9 = vsub.s32 4294967266, %v1854_v12  ;;  %v1094_v43 = vsel %vm1088_vm14, %v1091_v21, %v1093_v37  ;;  %v1899_v60 = vsel %vm1898_vm1, %v1897_v28, 0 }
 0x268   :  { %v3558_v52 = vmul.u32.u64.low %v1103_v1, %v1102_v6  ;;  %v3559_v20 = vmul.u32.u64.high %v1103_v1, %v1102_v6, %v3558_v52  ;;  %v1856_v58 = vshll.u32 %v3532_v35, %v1854_v12  ;;  %v1901_v8 = vand.u32 31, %v1899_v60 }
 0x269   :  { %v1857_v46 = vshrl.u32 %v1839_v22, %v1855_v13  ;;  %v1860_v51 = vadd.s32 127, %v1859_v9  ;;  %v1869_v45 = vsub.s32 4, %v3522_v42  ;;  %v1113_v0 = vadd.s32 1, %v3552_v50 }
 0x26a   :  { %vm1043_vm2 = vweird.f32 %v3288_v54  ;;  %vm1046_vm3 = vcmp.lt.s32.totalorder %v3524_v62, 2  ;;  %vm1785_vm4 = vcmp.lt.s32.totalorder %v3328_v49, 0  ;;  %vm1047_vm5 = vcmp.eq.s32.totalorder %v3524_v62, 0 }
 0x26b   :  { %v1858_v39 = vor.u32 %v1857_v46, %v1856_v58  ;;  %v1861_v5 = vshll.u32 %v1860_v51, 23  ;;  %v1110_v38 = vmul.u32 %v1103_v1, %v1094_v43  ;;  %vm1112_vm6 = vc.u32 %v3559_v20, %v3551_v26 }
 0x26c   :  { %v1902_v35 = vsub.s32 32, %v1901_v8  ;;  %vm1050_vm7 = vcmp.eq.s32.totalorder %v3524_v62, 2  ;;  %vm3573_vm8 = vcmp.le.f32.partialorder %v1783_v2, 0.7853982  ;;  %v1114_v11 = vsel %vm1112_vm6, %v1113_v0, %v3552_v50 }
 0x26d   :  { %v1862_v53 = vor.u32 4788187, %v1861_v5  ;;  %v1894_v47 = vand.u32 8388607, %v1887_v17  ;;  %v1870_v59 = vsel %vm1785_vm4, %v1869_v45, %v3522_v42  ;;  %v1115_v3 = vadd.s32 %v1114_v11, %v1110_v38 }
 0x26e   :  { %v3583_v19 = vshrl.u32 %v1899_v60, 5  ;;  %v1904_v24 = vshll.u32 %v2336_v23, %v1901_v8  ;;  %v1865_v32 = vcvt.s32.f32 %v1858_v39  ;;  %v1907_v30 = vshll.u32 %v2337_v27, %v1901_v8 }
 0x26f   :  { %v2248_v63 = vpop.eup %2247  ;;  %v1863_v1 = vand.u32 2147483647, %v1862_v53  ;;  %v1116_v41 = vadd.s32 536870912, %v1115_v3  ;;  %v1905_v15 = vshrl.u32 %v2337_v27, %v1902_v35  ;;  %v1908_v44 = vshrl.u32 %v2338_v29, %v1902_v35 }
 0x270   :  { %v2250_v2 = vpop.eup %2249  ;;  %v1051_v16 = vxor.u32 2147483648, %v2248_v63  ;;  %v1911_v34 = vshrl.u32 %v2339_v31, %v1902_v35  ;;  %v1914_v36 = vshrl.u32 %v2340_v33, %v1902_v35  ;;  %v1910_v57 = vshll.u32 %v2338_v29, %v1901_v8 }
 0x271   :  { %v1048_v55 = vxor.u32 2147483648, %v2250_v2  ;;  %v1866_v56 = vmul.f32 %v1865_v32, %v1863_v1  ;;  %v3595_v21 = vshrl.u32 %v1116_v41, 30  ;;  %v1917_v61 = vshrl.u32 %v2341_v40, %v1902_v35 }
 0x272   :  { %v1052_v42 = vsel %vm1050_vm7, %v1051_v16, %v2250_v2  ;;  %v1913_v37 = vshll.u32 %v2339_v31, %v1901_v8  ;;  %v1916_v48 = vshll.u32 %v2340_v33, %v1901_v8  ;;  %v1906_v6 = vor.u32 %v1905_v15, %v1904_v24 }
 0x273   :  { %v1049_v14 = vsel %vm1047_vm5, %v2248_v63, %v1048_v55  ;;  %v1867_v28 = vxor.u32 2147483648, %v1866_v56  ;;  %v1118_v12 = vshll.u32 %v3595_v21, 30  ;;  %v1909_v50 = vor.u32 %v1908_v44, %v1907_v30 }
 0x274   :  { %v1053_v27 = vsel %vm1046_vm3, %v1049_v14, %v1052_v42  ;;  %v1912_v40 = vor.u32 %v1911_v34, %v1910_v57  ;;  %v1915_v22 = vor.u32 %v1914_v36, %v1913_v37  ;;  %v1918_v62 = vor.u32 %v1917_v61, %v1916_v48 }
 0x275   :  { %v1054_v4 = vsel %vm1043_vm2, nan, %v1053_v27  ;;  %v1868_v29 = vsel %vm1785_vm4, %v1867_v28, %v1866_v56  ;;  %v1872_v33 = vsel %vm3573_vm8, 0, %v1870_v59  ;;  %v1119_v54 = vsub.s32 %v1115_v3, %v1118_v12 }
 0x276   :  { %1997 = vst [vmem:[#allocation8 + $0x30] sm:$0xff] %v1054_v4  ;;  %v1871_v31 = vsel %vm3573_vm8, %v3328_v49, %v1868_v29  ;;  %v1895_v13 = vor.u32 8388608, %v1894_v47  ;;  %v1903_v9 = vshrl.u32 %v2336_v23, %v1902_v35  ;;  %vm1919_vm9 = vcmp.lt.s32.totalorder %v3583_v19, 1 }
 0x277   :  { %2251 = vcosq.f32 %v1871_v31  ;;  %vm1921_vm10 = vcmp.lt.s32.totalorder %v3583_v19, 3  ;;  %v1121_v43 = vsub.s32 0, %v1119_v54  ;;  %vm1922_vm11 = vcmp.lt.s32.totalorder %v3583_v19, 4 }
 0x278   :  { %2253 = vsinq.f32 %v1871_v31  ;;  %v1927_v52 = vsel %vm1919_vm9, %v1906_v6, %v1909_v50  ;;  %v1924_v60 = vsel %vm1922_vm11, %v1912_v40, 2102212464  ;;  %v1928_v58 = vsel %vm1922_vm11, %v1915_v22, 920167782 }
 0x279   :  { %v1931_v46 = vsel %vm1919_vm9, %v1909_v50, %v1912_v40  ;;  %v1932_v51 = vsel %vm1922_vm11, %v1918_v62, 1326507024  ;;  %v2054_v8 = vmin.u32 %v1121_v43, %v1119_v54  ;;  %vm1920_vm12 = vcmp.lt.s32.totalorder %v3583_v19, 2 }
 0x27a   :  { %v1929_v23 = vsel %vm1921_vm10, %v1912_v40, %v1928_v58  ;;  %v1933_v45 = vsel %vm1921_vm10, %v1915_v22, %v1932_v51  ;;  %v1935_v5 = vshll.u32 %v1895_v13, 8  ;;  %v1876_v38 = vadd.s32 3, %v1872_v33 }
 0x27b   :  { %v1930_v0 = vsel %vm1920_vm12, %v1927_v52, %v1929_v23  ;;  %v1934_v39 = vsel %vm1920_vm12, %v1931_v46, %v1933_v45  ;;  %v1123_v35 = vclz %v2054_v8  ;;  %v1923_v18 = vsel %vm1919_vm9, %v1903_v9, %v1906_v6 }
 0x27c   :  { %v1925_v53 = vsel %vm1921_vm10, %v1909_v50, %v1924_v60  ;;  %v3630_v11 = vmul.u32.u64.low %v1935_v5, %v1934_v39  ;;  %v3631_v47 = vmul.u32.u64.high %v1935_v5, %v1934_v39, %v3630_v11  ;;  %v1877_v2 = vand.u32 3, %v1876_v38 }
 0x27d   :  { %v3633_v63 = vmul.u32.u64.low %v1935_v5, %v1930_v0  ;;  %v3634_v59 = vmul.u32.u64.high %v1935_v5, %v1930_v0, %v3633_v63  ;;  %v2055_v3 = vadd.s32 4294967294, %v1123_v35  ;;  %v1926_v24 = vsel %vm1920_vm12, %v1923_v18, %v1925_v53 }
 0x27e   :  { %v1111_v32 = vadd.s32 %v3551_v26, %v3559_v20  ;;  %v1942_v55 = vmul.u32 %v1935_v5, %v1926_v24  ;;  %vm1882_vm15 = vcmp.eq.s32.totalorder %v1877_v2, 2  ;;  %vm1879_vm0 = vcmp.eq.s32.totalorder %v1877_v2, 0 }
 0x27f   :  { %vm2056_vm13 = vcmp.lt.s32.totalorder %v2055_v3, 0  ;;  %vm1944_vm14 = vc.u32 %v3631_v47, %v3633_v63  ;;  %v1945_v1 = vadd.s32 1, %v3634_v59  ;;  %vm1878_vm1 = vcmp.lt.s32.totalorder %v1877_v2, 2 }
 0x280   :  { %v1126_v16 = vsel %vm2056_vm13, 0, %v2055_v3  ;;  %vm1875_vm2 = vweird.f32 %v3328_v49  ;;  %vm1057_vm3 = vcmp.lt.s32.totalorder %v3424_v25, 0  ;;  %v1141_v33 = vsub.s32 4, %v3595_v21 }
 0x281   :  { %v1127_v19 = vsub.s32 32, %v1126_v16  ;;  %v1131_v30 = vsub.s32 4294967266, %v1126_v16  ;;  %v1946_v41 = vsel %vm1944_vm14, %v1945_v1, %v3634_v59  ;;  %v1128_v44 = vshll.u32 %v1119_v54, %v1126_v16 }
 0x282   :  { %v1947_v34 = vadd.s32 %v1946_v41, %v1942_v55  ;;  %vm1056_vm4 = vcmp.le.f32.partialorder %v1055_v10, 0.7853982  ;;  %v1142_v43 = vsel %vm1057_vm3, %v1141_v33, %v3595_v21  ;;  %v1943_v46 = vadd.s32 %v3633_v63, %v3631_v47 }
 0x283   :  { %v1129_v42 = vshrl.u32 %v1111_v32, %v1127_v19  ;;  %v1132_v56 = vadd.s32 127, %v1131_v30  ;;  %v1144_v60 = vsel %vm1056_vm4, 0, %v1142_v43  ;;  %vm1147_vm9 = vweird.f32 %v3424_v25 }
 0x284   :  { %v2252_v15 = vpop.eup %2251  ;;  %v1948_v28 = vadd.s32 536870912, %v1947_v34  ;;  %v1148_v23 = vadd.s32 3, %v1144_v60  ;;  %vm1889_vm10 = vcmp.lt.s32.totalorder %v3514_v7, 0  ;;  %vm1888_vm11 = vcmp.le.f32.partialorder %v1887_v17, 0.7853982 }
 0x285   :  { %v2254_v36 = vpop.eup %2253  ;;  %v1883_v14 = vxor.u32 2147483648, %v2252_v15  ;;  %v1130_v61 = vor.u32 %v1129_v42, %v1128_v44  ;;  %v1133_v27 = vshll.u32 %v1132_v56, 23 }
 0x286   :  { %v1880_v57 = vxor.u32 2147483648, %v2254_v36  ;;  %v1949_v48 = vshrl.u32 %v1948_v28, 30  ;;  %v1149_v38 = vand.u32 3, %v1148_v23 }
 0x287   :  { %v1884_v37 = vsel %vm1882_vm15, %v1883_v14, %v2254_v36  ;;  %v1134_v20 = vor.u32 4788187, %v1133_v27  ;;  %v1137_v50 = vcvt.s32.f32 %v1130_v61  ;;  %vm1979_vm15 = vweird.f32 %v3514_v7 }
 0x288   :  { %v1881_v26 = vsel %vm1879_vm0, %v2252_v15, %v1880_v57  ;;  %v1950_v29 = vshll.u32 %v1949_v48, 30  ;;  %vm1154_vm6 = vcmp.eq.s32.totalorder %v1149_v38, 2  ;;  %vm1151_vm7 = vcmp.eq.s32.totalorder %v1149_v38, 0 }
 0x289   :  { %v1885_v4 = vsel %vm1878_vm1, %v1881_v26, %v1884_v37  ;;  %v1135_v6 = vand.u32 2147483647, %v1134_v20  ;;  %vm1150_vm8 = vcmp.lt.s32.totalorder %v1149_v38, 2  ;;  %v1973_v32 = vsub.s32 4, %v1949_v48 }
 0x28a   :  { %v1886_v12 = vsel %vm1875_vm2, nan, %v1885_v4  ;;  %v1951_v22 = vsub.s32 %v1947_v34, %v1950_v29 }
 0x28b   :  { %2005 = vst [vmem:[#allocation8 + $0x70] sm:$0xff] %v1886_v12  ;;  %v1138_v40 = vmul.f32 %v1137_v50, %v1135_v6  ;;  %v1974_v55 = vsel %vm1889_vm10, %v1973_v32, %v1949_v48 }
 0x28c   :  { %v1953_v31 = vsub.s32 0, %v1951_v22  ;;  %v1976_v41 = vsel %vm1888_vm11, 0, %v1974_v55 }
 0x28d   :  { %v1139_v62 = vxor.u32 2147483648, %v1138_v40  ;;  %v1980_v15 = vadd.s32 3, %v1976_v41 }
 0x28e   :  { %v2086_v13 = vmin.u32 %v1953_v31, %v1951_v22 }
 0x28f   :  { %v1140_v54 = vsel %vm1057_vm3, %v1139_v62, %v1138_v40  ;;  %v1981_v44 = vand.u32 3, %v1980_v15 }
 0x290   :  { %v1143_v49 = vsel %vm1056_vm4, %v3424_v25, %v1140_v54  ;;  %v1955_v9 = vclz %v2086_v13 }
 0x291   :  { %2255 = vcosq.f32 %v1143_v49  ;;  %vm1986_vm12 = vcmp.eq.s32.totalorder %v1981_v44, 2  ;;  %vm1983_vm13 = vcmp.eq.s32.totalorder %v1981_v44, 0  ;;  %vm1982_vm14 = vcmp.lt.s32.totalorder %v1981_v44, 2 }
 0x292   :  { %2257 = vsinq.f32 %v1143_v49  ;;  %v2087_v52 = vadd.s32 4294967294, %v1955_v9 }
 0x294   :  { %vm2088_vm5 = vcmp.lt.s32.totalorder %v2087_v52, 0 }
 0x295   :  { %v1958_v58 = vsel %vm2088_vm5, 0, %v2087_v52 }
 0x296   :  { %v1959_v51 = vsub.s32 32, %v1958_v58  ;;  %v1963_v8 = vsub.s32 4294967266, %v1958_v58  ;;  %v1960_v45 = vshll.u32 %v1951_v22, %v1958_v58 }
 0x298   :  { %v1961_v10 = vshrl.u32 %v1943_v46, %v1959_v51  ;;  %v1964_v0 = vadd.s32 127, %v1963_v8 }
 0x29a   :  { %v1962_v39 = vor.u32 %v1961_v10, %v1960_v45  ;;  %v1965_v5 = vshll.u32 %v1964_v0, 23 }
 0x29c   :  { %v1966_v35 = vor.u32 4788187, %v1965_v5  ;;  %v1969_v59 = vcvt.s32.f32 %v1962_v39 }
 0x29e   :  { %v2256_v18 = vpop.eup %2255  ;;  %v1967_v11 = vand.u32 2147483647, %v1966_v35 }
 0x29f   :  { %v2258_v53 = vpop.eup %2257  ;;  %v1155_v21 = vxor.u32 2147483648, %v2256_v18 }
 0x2a0   :  { %v1152_v3 = vxor.u32 2147483648, %v2258_v53  ;;  %v1970_v47 = vmul.f32 %v1969_v59, %v1967_v11 }
 0x2a1   :  { %v1156_v24 = vsel %vm1154_vm6, %v1155_v21, %v2258_v53 }
 0x2a2   :  { %v1153_v63 = vsel %vm1151_vm7, %v2256_v18, %v1152_v3  ;;  %v1971_v16 = vxor.u32 2147483648, %v1970_v47 }
 0x2a3   :  { %v1157_v2 = vsel %vm1150_vm8, %v1153_v63, %v1156_v24 }
 0x2a4   :  { %v1158_v1 = vsel %vm1147_vm9, nan, %v1157_v2  ;;  %v1972_v19 = vsel %vm1889_vm10, %v1971_v16, %v1970_v47 }
 0x2a5   :  { %1998 = vst [vmem:[#allocation8 + $0x38] sm:$0xff] %v1158_v1  ;;  %v1975_v30 = vsel %vm1888_vm11, %v3514_v7, %v1972_v19 }
 0x2a6   :  { %2259 = vcosq.f32 %v1975_v30 }
 0x2a7   :  { %2261 = vsinq.f32 %v1975_v30 }
 0x2b3   :  { %v2260_v25 = vpop.eup %2259 }
 0x2b4   :  { %v2262_v42 = vpop.eup %2261  ;;  %v1987_v56 = vxor.u32 2147483648, %v2260_v25 }
 0x2b5   :  { %v1984_v34 = vxor.u32 2147483648, %v2262_v42 }
 0x2b6   :  { %v1988_v36 = vsel %vm1986_vm12, %v1987_v56, %v2262_v42 }
 0x2b7   :  { %v1985_v17 = vsel %vm1983_vm13, %v2260_v25, %v1984_v34 }
 0x2b8   :  { %v1989_v14 = vsel %vm1982_vm14, %v1985_v17, %v1988_v36 }
 0x2b9   :  { %v1990_v57 = vsel %vm1979_vm15, nan, %v1989_v14 }
 0x2ba   :  { %2006 = vst [vmem:[#allocation8 + $0x78] sm:$0xff] %v1990_v57 }
 0x2bb   :  { %2314 = shalt.err (!%p2311_p0)
}
 0x2bc   :  { %2018 = dma.vmem_to_hbm [thread:$0]  %s2013_s26, 2048, %s3664_s3, [#allocation5], %s2333_s22, %s2333_s22, %s2334_s23  }
 0x2bd   :  { %2327 = dma.done.wait [#allocation5], 2048  }
 0x2be   :  { %2328 = vsyncadd [#allocation5], 4294965248 }
 0x2bf   :  { %2022 = vsyncpa [#allocation4], 1 }
 0x2c0   :  { %2023 = vsyncpa [#allocation7], 1 }
 0x2c1   :  { %2024 = vsyncpa [#allocation5], 1 }

</bundles_post_ra>
